<compile_context>
chip_gen: v6e
topology: v6e:2x2x1
jax: 0.10.0
libtpu: 0.0.40
codegen_flags: <defaults>
</compile_context>

<pallas_src>
import functools
import math

import jax
import jax.numpy as jnp
import numpy as np
from jax import lax
from jax.experimental import pallas as pl
from jax.experimental.pallas import tpu as pltpu


def _round_up(n: int, m: int) -> int:
    return ((n + m - 1) // m) * m


def _largest_divisor_leq(n: int, cap: int) -> int:
    cap = max(1, min(int(cap), n))
    for d in range(cap, 0, -1):
        if n % d == 0:
            return d
    return 1


def _sigmoid(x):
    # sigmoid(x) = 0.5*(tanh(0.5*x) + 1): one EUP tanh instead of exp + divide.
    return 0.5 * (jnp.tanh(0.5 * x) + 1.0)


def _device_defaults():
    """(vmem_limit_bytes or None, prefer_split_batch) from the device kind."""
    kind = ""
    try:
        kind = jax.devices()[0].device_kind.lower()
    except Exception:
        pass
    if "v7" in kind:
        # 64 MiB physical per TensorCore -> leave compiler headroom; 2 TCs/chip.
        return 48 * 1024 * 1024, True
    if any(tag in kind for tag in ("v4", "v5", "v6")):
        # 128 MiB physical VMEM.
        return 100 * 1024 * 1024, False
    # Unknown chip: don't force a limit (use compiler default), small budget.
    return None, False


def _choose_tiles(T, Bp, Dp, Hp, budget, time_cap, batch_block,
                  prefer_split_batch):
    """VMEM-aware (tb, tc) selection."""
    if batch_block is not None:
        tb = 8 * _largest_divisor_leq(Bp // 8, max(1, int(batch_block) // 8))
    elif prefer_split_batch and Bp >= 16 and (Bp // 2) % 8 == 0:
        tb = Bp // 2          # give the second TensorCore a batch tile (v7x)
    else:
        tb = Bp               # fill MXU rows (v5e/v6e)

    def fits(tb_, tc_):
        fixed = 4 * (Hp * 4 * Hp + Dp * 4 * Hp + 4 * Hp)   # resident W_hh^T, W_ih^T, bias
        fixed += 4 * 4 * (2 * tb_ * Hp)                    # h0/c0 in + hn/cn out (dbl-buffered)
        fixed += 4 * (2 * tb_ * Hp)                        # h/c carries
        # per-time-row: x + out double buffers + gates scratch (x2 headroom
        # for the matmul result temporary feeding the scratch store).
        per_tc = 4 * tb_ * (2 * Dp + 2 * Hp + 8 * Hp)
        return fixed + tc_ * per_tc <= budget

    while True:
        tc = max(1, min(int(time_cap), T))
        while tc > 1 and not fits(tb, tc):
            tc -= 1
        if fits(tb, tc) or tb <= 8:
            break
        tb = 8 * _largest_divisor_leq(Bp // 8, max(1, (tb // 8) // 2))
    return tb, tc


def _lstm_chunk_kernel(x_ref, h0_ref, c0_ref, wih_ref, whh_ref, bias_ref,
                       out_ref, hn_ref, cn_ref,
                       pg_sc, h_sc, c_sc,
                       *, hidden: int, time_block: int, seq_len: int,
                       reverse: bool, needs_mask: bool):
    """One grid step = `time_block` LSTM timesteps for one batch tile.

    Grid = (batch_tiles, time_chunks).  The recurrent carry (h, c) lives in
    VMEM scratch and persists across the sequential ("arbitrary") chunk axis.
    """
    H = hidden
    tc = time_block
    c_idx = pl.program_id(1)
    nc = pl.num_programs(1)

    @pl.when(c_idx == 0)
    def _():
        h_sc[...] = h0_ref[...].astype(jnp.float32)
        c_sc[...] = c0_ref[...].astype(jnp.float32)

    # ---- fused input projection for the whole chunk (M = tc*tb rows) -------
    tb = h_sc.shape[0]
    Dp = x_ref.shape[-1]
    x2 = x_ref[...].astype(jnp.float32).reshape(tc * tb, Dp)
    pg = jnp.dot(x2, wih_ref[...], preferred_element_type=jnp.float32)
    pg_sc[...] = (pg + bias_ref[...]).reshape(tc, tb, 4 * H)

    # Block index of this chunk within the (padded) time axis.
    blk_t = (nc - 1 - c_idx) if reverse else c_idx

    def body(i, carry):
        h, c = carry
        r = (tc - 1 - i) if reverse else i
        gates = pg_sc[r] + jnp.dot(h, whh_ref[...],
                                   preferred_element_type=jnp.float32)
        i_t = _sigmoid(gates[:, 0 * H:1 * H])
        f_t = _sigmoid(gates[:, 1 * H:2 * H])
        g_t = jnp.tanh(gates[:, 2 * H:3 * H])
        o_t = _sigmoid(gates[:, 3 * H:4 * H])
        c_new = f_t * c + i_t * g_t
        h_new = o_t * jnp.tanh(c_new)
        if needs_mask:
            # Padded timesteps (t >= seq_len) must not touch the carry.
            valid = (blk_t * tc + r) < seq_len
            h_new = jnp.where(valid, h_new, h)
            c_new = jnp.where(valid, c_new, c)
        out_ref[r] = h_new.astype(out_ref.dtype)
        return h_new, c_new

    h_fin, c_fin = lax.fori_loop(0, tc, body, (h_sc[...], c_sc[...]),
                                 unroll=min(tc, 8))
    h_sc[...] = h_fin
    c_sc[...] = c_fin

    # h_n/c_n blocks are time-resident (constant block index over c); only the
    # last chunk's value is written back, so gate the stores (saves vst slots).
    @pl.when(c_idx == nc - 1)
    def _():
        hn_ref[...] = h_fin.astype(hn_ref.dtype)
        cn_ref[...] = c_fin.astype(cn_ref.dtype)


def dp_lstm_layer_forward(x, state_init, params, *, reverse: bool = False,
                          dropout: float = 0.0, time_block: int = 16,
                          batch_block=None):
    """Forward pass of DPLSTMLayer (batch_sizes=None path).

    x: [T, B, D] float32
    state_init: (h_0, c_0), each [B, H]
    params: dict with w_ih [4H, D], w_hh [4H, H], b_ih [4H], b_hh [4H]
    Returns: output [T, B, H], (h_n [B, H], c_n [B, H])
    """
    # TODO(synk): PackedSequence path (batch_sizes is not None) not implemented.
    # nn.Dropout is identity in eval mode; dropout=0.0 matches exactly.
    del dropout

    T, B, D = x.shape
    h_0, c_0 = state_init
    H = h_0.shape[-1]
    out_dtype = x.dtype

    # ---- pad: hidden & input dims to lane multiples, batch to sublane mult --
    Hp = _round_up(H, 128)
    Bp = _round_up(B, 8)
    Dp = _round_up(D, 128)

    def pad_gate_rows(w):               # [4H, cols] -> [4Hp, cols], per-gate pad
        cols = w.shape[1]
        w4 = w.reshape(4, H, cols)
        w4 = jnp.pad(w4, ((0, 0), (0, Hp - H), (0, 0)))
        return w4.reshape(4 * Hp, cols)

    w_ih_p = pad_gate_rows(params["w_ih"]).astype(jnp.float32)   # [4Hp, D]
    w_ih_p = jnp.pad(w_ih_p, ((0, 0), (0, Dp - D)))              # [4Hp, Dp]
    w_hh_p = pad_gate_rows(params["w_hh"]).astype(jnp.float32)   # [4Hp, H]
    w_hh_p = jnp.pad(w_hh_p, ((0, 0), (0, Hp - H)))              # [4Hp, Hp]
    w_ih_t = w_ih_p.T                                            # [Dp, 4Hp]
    w_hh_t = w_hh_p.T                                            # [Hp, 4Hp]
    bias = (params["b_ih"] + params["b_hh"]).reshape(4, H).astype(jnp.float32)
    bias_p = jnp.pad(bias, ((0, 0), (0, Hp - H))).reshape(1, 4 * Hp)

    # ---- chip-aware VMEM budget & tiling ------------------------------------
    vmem_limit, prefer_split_batch = _device_defaults()
    budget = int(0.75 * vmem_limit) if vmem_limit else 12 * 1024 * 1024
    tb, tc = _choose_tiles(T, Bp, Dp, Hp, budget, time_block, batch_block,
                           prefer_split_batch)
    Tp = _round_up(T, tc)            # pad T so tc never collapses to 1
    nc = Tp // tc
    nb = Bp // tb
    needs_mask = Tp != T

    x_p = jnp.pad(x, ((0, Tp - T), (0, Bp - B), (0, Dp - D))).astype(jnp.float32)
    h0_p = jnp.pad(h_0, ((0, Bp - B), (0, Hp - H))).astype(jnp.float32)
    c0_p = jnp.pad(c_0, ((0, Bp - B), (0, Hp - H))).astype(jnp.float32)

    # reverse handled purely by index_map: first-processed chunk is the last one
    if reverse:
        def t_map(b, c):
            return (nc - 1 - c, b, 0)
    else:
        def t_map(b, c):
            return (c, b, 0)

    kernel = functools.partial(_lstm_chunk_kernel, hidden=Hp, time_block=tc,
                               seq_len=T, reverse=reverse,
                               needs_mask=needs_mask)

    grid_spec = pltpu.PrefetchScalarGridSpec(
        num_scalar_prefetch=0,
        grid=(nb, nc),
        in_specs=[
            pl.BlockSpec((tc, tb, Dp), t_map),                    # x chunk
            pl.BlockSpec((tb, Hp), lambda b, c: (b, 0)),          # h_0 tile
            pl.BlockSpec((tb, Hp), lambda b, c: (b, 0)),          # c_0 tile
            pl.BlockSpec((Dp, 4 * Hp), lambda b, c: (0, 0),
                         pipeline_mode=pl.Buffered(1)),           # W_ih^T resident
            pl.BlockSpec((Hp, 4 * Hp), lambda b, c: (0, 0),
                         pipeline_mode=pl.Buffered(1)),           # W_hh^T resident
            pl.BlockSpec((1, 4 * Hp), lambda b, c: (0, 0),
                         pipeline_mode=pl.Buffered(1)),           # bias resident
        ],
        out_specs=[
            pl.BlockSpec((tc, tb, Hp), t_map),                    # output chunk
            pl.BlockSpec((tb, Hp), lambda b, c: (b, 0)),          # h_n
            pl.BlockSpec((tb, Hp), lambda b, c: (b, 0)),          # c_n
        ],
        scratch_shapes=[
            pltpu.VMEM((tc, tb, 4 * Hp), jnp.float32),  # chunk gate pre-acts
            pltpu.VMEM((tb, Hp), jnp.float32),          # h carry
            pltpu.VMEM((tb, Hp), jnp.float32),          # c carry
        ],
    )

    cp_kwargs = dict(dimension_semantics=("parallel", "arbitrary"))
    if vmem_limit is not None:
        cp_kwargs["vmem_limit_bytes"] = vmem_limit

    out_p, hn_p, cn_p = pl.pallas_call(
        kernel,
        grid_spec=grid_spec,
        out_shape=(
            jax.ShapeDtypeStruct((Tp, Bp, Hp), out_dtype),
            jax.ShapeDtypeStruct((Bp, Hp), out_dtype),
            jax.ShapeDtypeStruct((Bp, Hp), out_dtype),
        ),
        compiler_params=pltpu.CompilerParams(**cp_kwargs),
    )(x_p, h0_p, c0_p, w_ih_t, w_hh_t, bias_p)

    out = out_p[:T, :B, :H]
    h_n = hn_p[:B, :H]
    c_n = cn_p[:B, :H]
    return out, (h_n, c_n)


def _reference_forward(x, state_init, params, *, reverse: bool = False):
    """Pure-JAX reference matching the PyTorch DPLSTMLayer semantics."""
    H = state_init[0].shape[-1]
    if reverse:
        x = jnp.flip(x, axis=0)
    w_ih_t = params["w_ih"].T
    w_hh_t = params["w_hh"].T
    b = params["b_ih"] + params["b_hh"]

    def step(carry, x_t):
        h_prev, c_prev = carry
        gates = x_t @ w_ih_t + h_prev @ w_hh_t + b
        i_t = jax.nn.sigmoid(gates[:, 0 * H:1 * H])
        f_t = jax.nn.sigmoid(gates[:, 1 * H:2 * H])
        g_t = jnp.tanh(gates[:, 2 * H:3 * H])
        o_t = jax.nn.sigmoid(gates[:, 3 * H:4 * H])
        c_t = f_t * c_prev + i_t * g_t
        h_t = o_t * jnp.tanh(c_t)
        return (h_t, c_t), h_t

    (h_n, c_n), hs = jax.lax.scan(step, state_init, x)
    if reverse:
        hs = jnp.flip(hs, axis=0)
    return hs, (h_n, c_n)


def init_params(key, input_size: int, hidden_size: int):
    """Deterministic init mirroring DPLSTMCell.reset_parameters: U(-stdv, stdv)."""
    stdv = 1.0 / math.sqrt(hidden_size)
    k1, k2, k3, k4 = jax.random.split(key, 4)
    return {
        "w_ih": jax.random.uniform(k1, (4 * hidden_size, input_size),
                                   jnp.float32, -stdv, stdv),
        "w_hh": jax.random.uniform(k2, (4 * hidden_size, hidden_size),
                                   jnp.float32, -stdv, stdv),
        "b_ih": jax.random.uniform(k3, (4 * hidden_size,),
                                   jnp.float32, -stdv, stdv),
        "b_hh": jax.random.uniform(k4, (4 * hidden_size,),
                                   jnp.float32, -stdv, stdv),
    }


if __name__ == "__main__":
    key = jax.random.PRNGKey(0)
    k_p, k_x, k_h, k_c = jax.random.split(key, 4)

    fwd = jax.jit(dp_lstm_layer_forward,
                  static_argnames=("reverse", "dropout", "time_block",
                                   "batch_block"))

    # (T, B, D, H, time_block): second config forces T % tc != 0 so the
    # padded-timestep masking path is exercised too.
    configs = [(8, 4, 16, 32, 16), (13, 4, 16, 32, 4)]

    for (T, B, D, H, tblk) in configs:
        params = init_params(k_p, D, H)
        x = jax.random.normal(k_x, (T, B, D), jnp.float32)
        h_0 = jax.random.normal(k_h, (B, H), jnp.float32)
        c_0 = jax.random.normal(k_c, (B, H), jnp.float32)

        for rev in (False, True):
            out, (h_n, c_n) = fwd(x, (h_0, c_0), params, reverse=rev,
                                  time_block=tblk)
            out = jax.block_until_ready(out)
            h_n = jax.block_until_ready(h_n)
            c_n = jax.block_until_ready(c_n)

            ref_out, (ref_h, ref_c) = _reference_forward(x, (h_0, c_0), params,
                                                         reverse=rev)
            # f32 end-to-end; 1e-4 leaves margin for Mosaic-vs-XLA matmul
            # rounding on the fused input projection (no bf16 anywhere).
            np.testing.assert_allclose(np.asarray(out), np.asarray(ref_out),
                                       rtol=1e-4, atol=1e-4)
            np.testing.assert_allclose(np.asarray(h_n), np.asarray(ref_h),
                                       rtol=1e-4, atol=1e-4)
            np.testing.assert_allclose(np.asarray(c_n), np.asarray(ref_c),
                                       rtol=1e-4, atol=1e-4)

    print("KERNEL_OK")
</pallas_src>

<mosaic_0001>
module attributes {stable_mosaic.version = 11 : i64} {
  func.func @_lstm_chunk_kernel(%arg0: i32, %arg1: i32, %arg2: memref<8x8x128xf32, #tpu.memory_space<vmem>>, %arg3: memref<8x128xf32, #tpu.memory_space<vmem>>, %arg4: memref<8x128xf32, #tpu.memory_space<vmem>>, %arg5: memref<128x512xf32, #tpu.memory_space<vmem>>, %arg6: memref<128x512xf32, #tpu.memory_space<vmem>>, %arg7: memref<1x512xf32, #tpu.memory_space<vmem>>, %arg8: memref<8x8x128xf32, #tpu.memory_space<vmem>>, %arg9: memref<8x128xf32, #tpu.memory_space<vmem>>, %arg10: memref<8x128xf32, #tpu.memory_space<vmem>>, %arg11: memref<8x8x512xf32, #tpu.memory_space<vmem>>, %arg12: memref<8x128xf32, #tpu.memory_space<vmem>>, %arg13: memref<8x128xf32, #tpu.memory_space<vmem>>) attributes {dimension_semantics = [#tpu.dimension_semantics<parallel>, #tpu.dimension_semantics<arbitrary>], iteration_bounds = array<i64: 1, 1>, scalar_prefetch = 0 : i64, scratch_operands = 3 : i64, tpu.core_type = #tpu.core_type<tc>, window_params = [{transform_indices = @transform_0, window_bounds = array<i64: 8, 8, 128>}, {transform_indices = @transform_1, window_bounds = array<i64: 8, 128>}, {transform_indices = @transform_2, window_bounds = array<i64: 8, 128>}, {pipeline_mode = #tpu.pipeline_mode<synchronous>, transform_indices = @transform_3, window_bounds = array<i64: 128, 512>}, {pipeline_mode = #tpu.pipeline_mode<synchronous>, transform_indices = @transform_4, window_bounds = array<i64: 128, 512>}, {pipeline_mode = #tpu.pipeline_mode<synchronous>, transform_indices = @transform_5, window_bounds = array<i64: 1, 512>}, {transform_indices = @transform_6, window_bounds = array<i64: 8, 8, 128>}, {transform_indices = @transform_7, window_bounds = array<i64: 8, 128>}, {transform_indices = @transform_8, window_bounds = array<i64: 8, 128>}]} {
    %c0_i32 = arith.constant 0 : i32
    %0 = arith.cmpi eq, %arg1, %c0_i32 : i32
    %1 = arith.extui %0 : i1 to i32
    %c0_i32_0 = arith.constant 0 : i32
    %2 = arith.cmpi ne, %1, %c0_i32_0 : i32
    scf.if %2 {
      %c0_149 = arith.constant 0 : index
      %c0_150 = arith.constant 0 : index
      %347 = vector.load %arg3[%c0_149, %c0_150] : memref<8x128xf32, #tpu.memory_space<vmem>>, vector<8x128xf32>
      %c0_151 = arith.constant 0 : index
      %c0_152 = arith.constant 0 : index
      %348 = vector.load %arg12[%c0_151, %c0_152] : memref<8x128xf32, #tpu.memory_space<vmem>>, vector<8x128xf32>
      tpu.vector_store %arg12[%c0_151, %c0_152], %347 {strides = array<i32>} : memref<8x128xf32, #tpu.memory_space<vmem>>, vector<8x128xf32>,
      %c0_153 = arith.constant 0 : index
      %c0_154 = arith.constant 0 : index
      %349 = vector.load %arg4[%c0_153, %c0_154] : memref<8x128xf32, #tpu.memory_space<vmem>>, vector<8x128xf32>
      %c0_155 = arith.constant 0 : index
      %c0_156 = arith.constant 0 : index
      %350 = vector.load %arg13[%c0_155, %c0_156] : memref<8x128xf32, #tpu.memory_space<vmem>>, vector<8x128xf32>
      tpu.vector_store %arg13[%c0_155, %c0_156], %349 {strides = array<i32>} : memref<8x128xf32, #tpu.memory_space<vmem>>, vector<8x128xf32>,
    } else {
    }
    %c0 = arith.constant 0 : index
    %c0_1 = arith.constant 0 : index
    %c0_2 = arith.constant 0 : index
    %3 = vector.load %arg2[%c0, %c0_1, %c0_2] : memref<8x8x128xf32, #tpu.memory_space<vmem>>, vector<8x8x128xf32>
    %4 = vector.shape_cast %3 : vector<8x8x128xf32> to vector<64x128xf32>
    %c0_3 = arith.constant 0 : index
    %c0_4 = arith.constant 0 : index
    %5 = vector.load %arg5[%c0_3, %c0_4] : memref<128x512xf32, #tpu.memory_space<vmem>>, vector<128x512xf32>
    %cst = arith.constant dense<0.000000e+00> : vector<64x512xf32>
    %6 = tpu.matmul %4, %5, %cst {dimension_numbers = #tpu.dot_dimension_numbers<[1], [0], [0], [1], [0, 0, 1, 1], [], []>} : vector<64x128xf32>, vector<128x512xf32>, vector<64x512xf32> -> vector<64x512xf32>
    %c0_5 = arith.constant 0 : index
    %c0_6 = arith.constant 0 : index
    %7 = vector.load %arg7[%c0_5, %c0_6] : memref<1x512xf32, #tpu.memory_space<vmem>>, vector<1x512xf32>
    %8 = vector.broadcast %7 : vector<1x512xf32> to vector<64x512xf32>
    %9 = arith.addf %6, %8 : vector<64x512xf32>
    %10 = vector.shape_cast %9 : vector<64x512xf32> to vector<8x8x512xf32>
    %c0_7 = arith.constant 0 : index
    %c0_8 = arith.constant 0 : index
    %c0_9 = arith.constant 0 : index
    %11 = vector.load %arg11[%c0_7, %c0_8, %c0_9] : memref<8x8x512xf32, #tpu.memory_space<vmem>>, vector<8x8x512xf32>
    tpu.vector_store %arg11[%c0_7, %c0_8, %c0_9], %10 {strides = array<i32>} : memref<8x8x512xf32, #tpu.memory_space<vmem>>, vector<8x8x512xf32>,
    %c0_10 = arith.constant 0 : index
    %c0_11 = arith.constant 0 : index
    %12 = vector.load %arg12[%c0_10, %c0_11] : memref<8x128xf32, #tpu.memory_space<vmem>>, vector<8x128xf32>
    %c0_12 = arith.constant 0 : index
    %c0_13 = arith.constant 0 : index
    %13 = vector.load %arg13[%c0_12, %c0_13] : memref<8x128xf32, #tpu.memory_space<vmem>>, vector<8x128xf32>
    %c0_i32_14 = arith.constant 0 : i32
    %14 = arith.index_cast %c0_i32_14 : i32 to index
    %c0_15 = arith.constant 0 : index
    %c0_16 = arith.constant 0 : index
    %15 = vector.load %arg11[%14, %c0_15, %c0_16] : memref<8x8x512xf32, #tpu.memory_space<vmem>>, vector<1x8x512xf32>
    %16 = vector.shape_cast %15 : vector<1x8x512xf32> to vector<8x512xf32>
    %c0_17 = arith.constant 0 : index
    %c0_18 = arith.constant 0 : index
    %17 = vector.load %arg6[%c0_17, %c0_18] : memref<128x512xf32, #tpu.memory_space<vmem>>, vector<128x512xf32>
    %cst_19 = arith.constant dense<0.000000e+00> : vector<8x512xf32>
    %18 = tpu.matmul %12, %17, %cst_19 {dimension_numbers = #tpu.dot_dimension_numbers<[1], [0], [0], [1], [0, 0, 1, 1], [], []>} : vector<8x128xf32>, vector<128x512xf32>, vector<8x512xf32> -> vector<8x512xf32>
    %19 = arith.addf %16, %18 : vector<8x512xf32>
    %20 = vector.extract_strided_slice %19 {offsets = [0, 0], sizes = [8, 128], strides = [1, 1]} : vector<8x512xf32> to vector<8x128xf32>
    %cst_20 = arith.constant 5.000000e-01 : f32
    %21 = vector.broadcast %cst_20 : f32 to vector<8x128xf32>
    %22 = arith.mulf %21, %20 : vector<8x128xf32>
    %23 = math.tanh %22 : vector<8x128xf32>
    %cst_21 = arith.constant 1.000000e+00 : f32
    %24 = vector.broadcast %cst_21 : f32 to vector<8x128xf32>
    %25 = arith.addf %23, %24 : vector<8x128xf32>
    %cst_22 = arith.constant 5.000000e-01 : f32
    %26 = vector.broadcast %cst_22 : f32 to vector<8x128xf32>
    %27 = arith.mulf %26, %25 : vector<8x128xf32>
    %28 = vector.extract_strided_slice %19 {offsets = [0, 128], sizes = [8, 128], strides = [1, 1]} : vector<8x512xf32> to vector<8x128xf32>
    %cst_23 = arith.constant 5.000000e-01 : f32
    %29 = vector.broadcast %cst_23 : f32 to vector<8x128xf32>
    %30 = arith.mulf %29, %28 : vector<8x128xf32>
    %31 = math.tanh %30 : vector<8x128xf32>
    %cst_24 = arith.constant 1.000000e+00 : f32
    %32 = vector.broadcast %cst_24 : f32 to vector<8x128xf32>
    %33 = arith.addf %31, %32 : vector<8x128xf32>
    %cst_25 = arith.constant 5.000000e-01 : f32
    %34 = vector.broadcast %cst_25 : f32 to vector<8x128xf32>
    %35 = arith.mulf %34, %33 : vector<8x128xf32>
    %36 = vector.extract_strided_slice %19 {offsets = [0, 256], sizes = [8, 128], strides = [1, 1]} : vector<8x512xf32> to vector<8x128xf32>
    %37 = math.tanh %36 : vector<8x128xf32>
    %38 = vector.extract_strided_slice %19 {offsets = [0, 384], sizes = [8, 128], strides = [1, 1]} : vector<8x512xf32> to vector<8x128xf32>
    %cst_26 = arith.constant 5.000000e-01 : f32
    %39 = vector.broadcast %cst_26 : f32 to vector<8x128xf32>
    %40 = arith.mulf %39, %38 : vector<8x128xf32>
    %41 = math.tanh %40 : vector<8x128xf32>
    %cst_27 = arith.constant 1.000000e+00 : f32
    %42 = vector.broadcast %cst_27 : f32 to vector<8x128xf32>
    %43 = arith.addf %41, %42 : vector<8x128xf32>
    %cst_28 = arith.constant 5.000000e-01 : f32
    %44 = vector.broadcast %cst_28 : f32 to vector<8x128xf32>
    %45 = arith.mulf %44, %43 : vector<8x128xf32>
    %46 = arith.mulf %35, %13 : vector<8x128xf32>
    %47 = arith.mulf %27, %37 : vector<8x128xf32>
    %48 = arith.addf %46, %47 : vector<8x128xf32>
    %49 = math.tanh %48 : vector<8x128xf32>
    %50 = arith.mulf %45, %49 : vector<8x128xf32>
    %51 = arith.index_cast %c0_i32_14 : i32 to index
    %c0_29 = arith.constant 0 : index
    %c0_30 = arith.constant 0 : index
    %52 = vector.load %arg8[%51, %c0_29, %c0_30] : memref<8x8x128xf32, #tpu.memory_space<vmem>>, vector<1x8x128xf32>
    %53 = vector.shape_cast %52 : vector<1x8x128xf32> to vector<8x128xf32>
    %54 = vector.shape_cast %50 : vector<8x128xf32> to vector<1x8x128xf32>
    tpu.vector_store %arg8[%51, %c0_29, %c0_30], %54 {strides = array<i32>} : memref<8x8x128xf32, #tpu.memory_space<vmem>>, vector<1x8x128xf32>,
    %c1_i32 = arith.constant 1 : i32
    %55 = arith.index_cast %c1_i32 : i32 to index
    %c0_31 = arith.constant 0 : index
    %c0_32 = arith.constant 0 : index
    %56 = vector.load %arg11[%55, %c0_31, %c0_32] : memref<8x8x512xf32, #tpu.memory_space<vmem>>, vector<1x8x512xf32>
    %57 = vector.shape_cast %56 : vector<1x8x512xf32> to vector<8x512xf32>
    %c0_33 = arith.constant 0 : index
    %c0_34 = arith.constant 0 : index
    %58 = vector.load %arg6[%c0_33, %c0_34] : memref<128x512xf32, #tpu.memory_space<vmem>>, vector<128x512xf32>
    %cst_35 = arith.constant dense<0.000000e+00> : vector<8x512xf32>
    %59 = tpu.matmul %50, %58, %cst_35 {dimension_numbers = #tpu.dot_dimension_numbers<[1], [0], [0], [1], [0, 0, 1, 1], [], []>} : vector<8x128xf32>, vector<128x512xf32>, vector<8x512xf32> -> vector<8x512xf32>
    %60 = arith.addf %57, %59 : vector<8x512xf32>
    %61 = vector.extract_strided_slice %60 {offsets = [0, 0], sizes = [8, 128], strides = [1, 1]} : vector<8x512xf32> to vector<8x128xf32>
    %cst_36 = arith.constant 5.000000e-01 : f32
    %62 = vector.broadcast %cst_36 : f32 to vector<8x128xf32>
    %63 = arith.mulf %62, %61 : vector<8x128xf32>
    %64 = math.tanh %63 : vector<8x128xf32>
    %cst_37 = arith.constant 1.000000e+00 : f32
    %65 = vector.broadcast %cst_37 : f32 to vector<8x128xf32>
    %66 = arith.addf %64, %65 : vector<8x128xf32>
    %cst_38 = arith.constant 5.000000e-01 : f32
    %67 = vector.broadcast %cst_38 : f32 to vector<8x128xf32>
    %68 = arith.mulf %67, %66 : vector<8x128xf32>
    %69 = vector.extract_strided_slice %60 {offsets = [0, 128], sizes = [8, 128], strides = [1, 1]} : vector<8x512xf32> to vector<8x128xf32>
    %cst_39 = arith.constant 5.000000e-01 : f32
    %70 = vector.broadcast %cst_39 : f32 to vector<8x128xf32>
    %71 = arith.mulf %70, %69 : vector<8x128xf32>
    %72 = math.tanh %71 : vector<8x128xf32>
    %cst_40 = arith.constant 1.000000e+00 : f32
    %73 = vector.broadcast %cst_40 : f32 to vector<8x128xf32>
    %74 = arith.addf %72, %73 : vector<8x128xf32>
    %cst_41 = arith.constant 5.000000e-01 : f32
    %75 = vector.broadcast %cst_41 : f32 to vector<8x128xf32>
    %76 = arith.mulf %75, %74 : vector<8x128xf32>
    %77 = vector.extract_strided_slice %60 {offsets = [0, 256], sizes = [8, 128], strides = [1, 1]} : vector<8x512xf32> to vector<8x128xf32>
    %78 = math.tanh %77 : vector<8x128xf32>
    %79 = vector.extract_strided_slice %60 {offsets = [0, 384], sizes = [8, 128], strides = [1, 1]} : vector<8x512xf32> to vector<8x128xf32>
    %cst_42 = arith.constant 5.000000e-01 : f32
    %80 = vector.broadcast %cst_42 : f32 to vector<8x128xf32>
    %81 = arith.mulf %80, %79 : vector<8x128xf32>
    %82 = math.tanh %81 : vector<8x128xf32>
    %cst_43 = arith.constant 1.000000e+00 : f32
    %83 = vector.broadcast %cst_43 : f32 to vector<8x128xf32>
    %84 = arith.addf %82, %83 : vector<8x128xf32>
    %cst_44 = arith.constant 5.000000e-01 : f32
    %85 = vector.broadcast %cst_44 : f32 to vector<8x128xf32>
    %86 = arith.mulf %85, %84 : vector<8x128xf32>
    %87 = arith.mulf %76, %48 : vector<8x128xf32>
    %88 = arith.mulf %68, %78 : vector<8x128xf32>
    %89 = arith.addf %87, %88 : vector<8x128xf32>
    %90 = math.tanh %89 : vector<8x128xf32>
    %91 = arith.mulf %86, %90 : vector<8x128xf32>
    %92 = arith.index_cast %c1_i32 : i32 to index
    %c0_45 = arith.constant 0 : index
    %c0_46 = arith.constant 0 : index
    %93 = vector.load %arg8[%92, %c0_45, %c0_46] : memref<8x8x128xf32, #tpu.memory_space<vmem>>, vector<1x8x128xf32>
    %94 = vector.shape_cast %93 : vector<1x8x128xf32> to vector<8x128xf32>
    %95 = vector.shape_cast %91 : vector<8x128xf32> to vector<1x8x128xf32>
    tpu.vector_store %arg8[%92, %c0_45, %c0_46], %95 {strides = array<i32>} : memref<8x8x128xf32, #tpu.memory_space<vmem>>, vector<1x8x128xf32>,
    %c2_i32 = arith.constant 2 : i32
    %96 = arith.index_cast %c2_i32 : i32 to index
    %c0_47 = arith.constant 0 : index
    %c0_48 = arith.constant 0 : index
    %97 = vector.load %arg11[%96, %c0_47, %c0_48] : memref<8x8x512xf32, #tpu.memory_space<vmem>>, vector<1x8x512xf32>
    %98 = vector.shape_cast %97 : vector<1x8x512xf32> to vector<8x512xf32>
    %c0_49 = arith.constant 0 : index
    %c0_50 = arith.constant 0 : index
    %99 = vector.load %arg6[%c0_49, %c0_50] : memref<128x512xf32, #tpu.memory_space<vmem>>, vector<128x512xf32>
    %cst_51 = arith.constant dense<0.000000e+00> : vector<8x512xf32>
    %100 = tpu.matmul %91, %99, %cst_51 {dimension_numbers = #tpu.dot_dimension_numbers<[1], [0], [0], [1], [0, 0, 1, 1], [], []>} : vector<8x128xf32>, vector<128x512xf32>, vector<8x512xf32> -> vector<8x512xf32>
    %101 = arith.addf %98, %100 : vector<8x512xf32>
    %102 = vector.extract_strided_slice %101 {offsets = [0, 0], sizes = [8, 128], strides = [1, 1]} : vector<8x512xf32> to vector<8x128xf32>
    %cst_52 = arith.constant 5.000000e-01 : f32
    %103 = vector.broadcast %cst_52 : f32 to vector<8x128xf32>
    %104 = arith.mulf %103, %102 : vector<8x128xf32>
    %105 = math.tanh %104 : vector<8x128xf32>
    %cst_53 = arith.constant 1.000000e+00 : f32
    %106 = vector.broadcast %cst_53 : f32 to vector<8x128xf32>
    %107 = arith.addf %105, %106 : vector<8x128xf32>
    %cst_54 = arith.constant 5.000000e-01 : f32
    %108 = vector.broadcast %cst_54 : f32 to vector<8x128xf32>
    %109 = arith.mulf %108, %107 : vector<8x128xf32>
    %110 = vector.extract_strided_slice %101 {offsets = [0, 128], sizes = [8, 128], strides = [1, 1]} : vector<8x512xf32> to vector<8x128xf32>
    %cst_55 = arith.constant 5.000000e-01 : f32
    %111 = vector.broadcast %cst_55 : f32 to vector<8x128xf32>
    %112 = arith.mulf %111, %110 : vector<8x128xf32>
    %113 = math.tanh %112 : vector<8x128xf32>
    %cst_56 = arith.constant 1.000000e+00 : f32
    %114 = vector.broadcast %cst_56 : f32 to vector<8x128xf32>
    %115 = arith.addf %113, %114 : vector<8x128xf32>
    %cst_57 = arith.constant 5.000000e-01 : f32
    %116 = vector.broadcast %cst_57 : f32 to vector<8x128xf32>
    %117 = arith.mulf %116, %115 : vector<8x128xf32>
    %118 = vector.extract_strided_slice %101 {offsets = [0, 256], sizes = [8, 128], strides = [1, 1]} : vector<8x512xf32> to vector<8x128xf32>
    %119 = math.tanh %118 : vector<8x128xf32>
    %120 = vector.extract_strided_slice %101 {offsets = [0, 384], sizes = [8, 128], strides = [1, 1]} : vector<8x512xf32> to vector<8x128xf32>
    %cst_58 = arith.constant 5.000000e-01 : f32
    %121 = vector.broadcast %cst_58 : f32 to vector<8x128xf32>
    %122 = arith.mulf %121, %120 : vector<8x128xf32>
    %123 = math.tanh %122 : vector<8x128xf32>
    %cst_59 = arith.constant 1.000000e+00 : f32
    %124 = vector.broadcast %cst_59 : f32 to vector<8x128xf32>
    %125 = arith.addf %123, %124 : vector<8x128xf32>
    %cst_60 = arith.constant 5.000000e-01 : f32
    %126 = vector.broadcast %cst_60 : f32 to vector<8x128xf32>
    %127 = arith.mulf %126, %125 : vector<8x128xf32>
    %128 = arith.mulf %117, %89 : vector<8x128xf32>
    %129 = arith.mulf %109, %119 : vector<8x128xf32>
    %130 = arith.addf %128, %129 : vector<8x128xf32>
    %131 = math.tanh %130 : vector<8x128xf32>
    %132 = arith.mulf %127, %131 : vector<8x128xf32>
    %133 = arith.index_cast %c2_i32 : i32 to index
    %c0_61 = arith.constant 0 : index
    %c0_62 = arith.constant 0 : index
    %134 = vector.load %arg8[%133, %c0_61, %c0_62] : memref<8x8x128xf32, #tpu.memory_space<vmem>>, vector<1x8x128xf32>
    %135 = vector.shape_cast %134 : vector<1x8x128xf32> to vector<8x128xf32>
    %136 = vector.shape_cast %132 : vector<8x128xf32> to vector<1x8x128xf32>
    tpu.vector_store %arg8[%133, %c0_61, %c0_62], %136 {strides = array<i32>} : memref<8x8x128xf32, #tpu.memory_space<vmem>>, vector<1x8x128xf32>,
    %c3_i32 = arith.constant 3 : i32
    %137 = arith.index_cast %c3_i32 : i32 to index
    %c0_63 = arith.constant 0 : index
    %c0_64 = arith.constant 0 : index
    %138 = vector.load %arg11[%137, %c0_63, %c0_64] : memref<8x8x512xf32, #tpu.memory_space<vmem>>, vector<1x8x512xf32>
    %139 = vector.shape_cast %138 : vector<1x8x512xf32> to vector<8x512xf32>
    %c0_65 = arith.constant 0 : index
    %c0_66 = arith.constant 0 : index
    %140 = vector.load %arg6[%c0_65, %c0_66] : memref<128x512xf32, #tpu.memory_space<vmem>>, vector<128x512xf32>
    %cst_67 = arith.constant dense<0.000000e+00> : vector<8x512xf32>
    %141 = tpu.matmul %132, %140, %cst_67 {dimension_numbers = #tpu.dot_dimension_numbers<[1], [0], [0], [1], [0, 0, 1, 1], [], []>} : vector<8x128xf32>, vector<128x512xf32>, vector<8x512xf32> -> vector<8x512xf32>
    %142 = arith.addf %139, %141 : vector<8x512xf32>
    %143 = vector.extract_strided_slice %142 {offsets = [0, 0], sizes = [8, 128], strides = [1, 1]} : vector<8x512xf32> to vector<8x128xf32>
    %cst_68 = arith.constant 5.000000e-01 : f32
    %144 = vector.broadcast %cst_68 : f32 to vector<8x128xf32>
    %145 = arith.mulf %144, %143 : vector<8x128xf32>
    %146 = math.tanh %145 : vector<8x128xf32>
    %cst_69 = arith.constant 1.000000e+00 : f32
    %147 = vector.broadcast %cst_69 : f32 to vector<8x128xf32>
    %148 = arith.addf %146, %147 : vector<8x128xf32>
    %cst_70 = arith.constant 5.000000e-01 : f32
    %149 = vector.broadcast %cst_70 : f32 to vector<8x128xf32>
    %150 = arith.mulf %149, %148 : vector<8x128xf32>
    %151 = vector.extract_strided_slice %142 {offsets = [0, 128], sizes = [8, 128], strides = [1, 1]} : vector<8x512xf32> to vector<8x128xf32>
    %cst_71 = arith.constant 5.000000e-01 : f32
    %152 = vector.broadcast %cst_71 : f32 to vector<8x128xf32>
    %153 = arith.mulf %152, %151 : vector<8x128xf32>
    %154 = math.tanh %153 : vector<8x128xf32>
    %cst_72 = arith.constant 1.000000e+00 : f32
    %155 = vector.broadcast %cst_72 : f32 to vector<8x128xf32>
    %156 = arith.addf %154, %155 : vector<8x128xf32>
    %cst_73 = arith.constant 5.000000e-01 : f32
    %157 = vector.broadcast %cst_73 : f32 to vector<8x128xf32>
    %158 = arith.mulf %157, %156 : vector<8x128xf32>
    %159 = vector.extract_strided_slice %142 {offsets = [0, 256], sizes = [8, 128], strides = [1, 1]} : vector<8x512xf32> to vector<8x128xf32>
    %160 = math.tanh %159 : vector<8x128xf32>
    %161 = vector.extract_strided_slice %142 {offsets = [0, 384], sizes = [8, 128], strides = [1, 1]} : vector<8x512xf32> to vector<8x128xf32>
    %cst_74 = arith.constant 5.000000e-01 : f32
    %162 = vector.broadcast %cst_74 : f32 to vector<8x128xf32>
    %163 = arith.mulf %162, %161 : vector<8x128xf32>
    %164 = math.tanh %163 : vector<8x128xf32>
    %cst_75 = arith.constant 1.000000e+00 : f32
    %165 = vector.broadcast %cst_75 : f32 to vector<8x128xf32>
    %166 = arith.addf %164, %165 : vector<8x128xf32>
    %cst_76 = arith.constant 5.000000e-01 : f32
    %167 = vector.broadcast %cst_76 : f32 to vector<8x128xf32>
    %168 = arith.mulf %167, %166 : vector<8x128xf32>
    %169 = arith.mulf %158, %130 : vector<8x128xf32>
    %170 = arith.mulf %150, %160 : vector<8x128xf32>
    %171 = arith.addf %169, %170 : vector<8x128xf32>
    %172 = math.tanh %171 : vector<8x128xf32>
    %173 = arith.mulf %168, %172 : vector<8x128xf32>
    %174 = arith.index_cast %c3_i32 : i32 to index
    %c0_77 = arith.constant 0 : index
    %c0_78 = arith.constant 0 : index
    %175 = vector.load %arg8[%174, %c0_77, %c0_78] : memref<8x8x128xf32, #tpu.memory_space<vmem>>, vector<1x8x128xf32>
    %176 = vector.shape_cast %175 : vector<1x8x128xf32> to vector<8x128xf32>
    %177 = vector.shape_cast %173 : vector<8x128xf32> to vector<1x8x128xf32>
    tpu.vector_store %arg8[%174, %c0_77, %c0_78], %177 {strides = array<i32>} : memref<8x8x128xf32, #tpu.memory_space<vmem>>, vector<1x8x128xf32>,
    %c4_i32 = arith.constant 4 : i32
    %178 = arith.index_cast %c4_i32 : i32 to index
    %c0_79 = arith.constant 0 : index
    %c0_80 = arith.constant 0 : index
    %179 = vector.load %arg11[%178, %c0_79, %c0_80] : memref<8x8x512xf32, #tpu.memory_space<vmem>>, vector<1x8x512xf32>
    %180 = vector.shape_cast %179 : vector<1x8x512xf32> to vector<8x512xf32>
    %c0_81 = arith.constant 0 : index
    %c0_82 = arith.constant 0 : index
    %181 = vector.load %arg6[%c0_81, %c0_82] : memref<128x512xf32, #tpu.memory_space<vmem>>, vector<128x512xf32>
    %cst_83 = arith.constant dense<0.000000e+00> : vector<8x512xf32>
    %182 = tpu.matmul %173, %181, %cst_83 {dimension_numbers = #tpu.dot_dimension_numbers<[1], [0], [0], [1], [0, 0, 1, 1], [], []>} : vector<8x128xf32>, vector<128x512xf32>, vector<8x512xf32> -> vector<8x512xf32>
    %183 = arith.addf %180, %182 : vector<8x512xf32>
    %184 = vector.extract_strided_slice %183 {offsets = [0, 0], sizes = [8, 128], strides = [1, 1]} : vector<8x512xf32> to vector<8x128xf32>
    %cst_84 = arith.constant 5.000000e-01 : f32
    %185 = vector.broadcast %cst_84 : f32 to vector<8x128xf32>
    %186 = arith.mulf %185, %184 : vector<8x128xf32>
    %187 = math.tanh %186 : vector<8x128xf32>
    %cst_85 = arith.constant 1.000000e+00 : f32
    %188 = vector.broadcast %cst_85 : f32 to vector<8x128xf32>
    %189 = arith.addf %187, %188 : vector<8x128xf32>
    %cst_86 = arith.constant 5.000000e-01 : f32
    %190 = vector.broadcast %cst_86 : f32 to vector<8x128xf32>
    %191 = arith.mulf %190, %189 : vector<8x128xf32>
    %192 = vector.extract_strided_slice %183 {offsets = [0, 128], sizes = [8, 128], strides = [1, 1]} : vector<8x512xf32> to vector<8x128xf32>
    %cst_87 = arith.constant 5.000000e-01 : f32
    %193 = vector.broadcast %cst_87 : f32 to vector<8x128xf32>
    %194 = arith.mulf %193, %192 : vector<8x128xf32>
    %195 = math.tanh %194 : vector<8x128xf32>
    %cst_88 = arith.constant 1.000000e+00 : f32
    %196 = vector.broadcast %cst_88 : f32 to vector<8x128xf32>
    %197 = arith.addf %195, %196 : vector<8x128xf32>
    %cst_89 = arith.constant 5.000000e-01 : f32
    %198 = vector.broadcast %cst_89 : f32 to vector<8x128xf32>
    %199 = arith.mulf %198, %197 : vector<8x128xf32>
    %200 = vector.extract_strided_slice %183 {offsets = [0, 256], sizes = [8, 128], strides = [1, 1]} : vector<8x512xf32> to vector<8x128xf32>
    %201 = math.tanh %200 : vector<8x128xf32>
    %202 = vector.extract_strided_slice %183 {offsets = [0, 384], sizes = [8, 128], strides = [1, 1]} : vector<8x512xf32> to vector<8x128xf32>
    %cst_90 = arith.constant 5.000000e-01 : f32
    %203 = vector.broadcast %cst_90 : f32 to vector<8x128xf32>
    %204 = arith.mulf %203, %202 : vector<8x128xf32>
    %205 = math.tanh %204 : vector<8x128xf32>
    %cst_91 = arith.constant 1.000000e+00 : f32
    %206 = vector.broadcast %cst_91 : f32 to vector<8x128xf32>
    %207 = arith.addf %205, %206 : vector<8x128xf32>
    %cst_92 = arith.constant 5.000000e-01 : f32
    %208 = vector.broadcast %cst_92 : f32 to vector<8x128xf32>
    %209 = arith.mulf %208, %207 : vector<8x128xf32>
    %210 = arith.mulf %199, %171 : vector<8x128xf32>
    %211 = arith.mulf %191, %201 : vector<8x128xf32>
    %212 = arith.addf %210, %211 : vector<8x128xf32>
    %213 = math.tanh %212 : vector<8x128xf32>
    %214 = arith.mulf %209, %213 : vector<8x128xf32>
    %215 = arith.index_cast %c4_i32 : i32 to index
    %c0_93 = arith.constant 0 : index
    %c0_94 = arith.constant 0 : index
    %216 = vector.load %arg8[%215, %c0_93, %c0_94] : memref<8x8x128xf32, #tpu.memory_space<vmem>>, vector<1x8x128xf32>
    %217 = vector.shape_cast %216 : vector<1x8x128xf32> to vector<8x128xf32>
    %218 = vector.shape_cast %214 : vector<8x128xf32> to vector<1x8x128xf32>
    tpu.vector_store %arg8[%215, %c0_93, %c0_94], %218 {strides = array<i32>} : memref<8x8x128xf32, #tpu.memory_space<vmem>>, vector<1x8x128xf32>,
    %c5_i32 = arith.constant 5 : i32
    %219 = arith.index_cast %c5_i32 : i32 to index
    %c0_95 = arith.constant 0 : index
    %c0_96 = arith.constant 0 : index
    %220 = vector.load %arg11[%219, %c0_95, %c0_96] : memref<8x8x512xf32, #tpu.memory_space<vmem>>, vector<1x8x512xf32>
    %221 = vector.shape_cast %220 : vector<1x8x512xf32> to vector<8x512xf32>
    %c0_97 = arith.constant 0 : index
    %c0_98 = arith.constant 0 : index
    %222 = vector.load %arg6[%c0_97, %c0_98] : memref<128x512xf32, #tpu.memory_space<vmem>>, vector<128x512xf32>
    %cst_99 = arith.constant dense<0.000000e+00> : vector<8x512xf32>
    %223 = tpu.matmul %214, %222, %cst_99 {dimension_numbers = #tpu.dot_dimension_numbers<[1], [0], [0], [1], [0, 0, 1, 1], [], []>} : vector<8x128xf32>, vector<128x512xf32>, vector<8x512xf32> -> vector<8x512xf32>
    %224 = arith.addf %221, %223 : vector<8x512xf32>
    %225 = vector.extract_strided_slice %224 {offsets = [0, 0], sizes = [8, 128], strides = [1, 1]} : vector<8x512xf32> to vector<8x128xf32>
    %cst_100 = arith.constant 5.000000e-01 : f32
    %226 = vector.broadcast %cst_100 : f32 to vector<8x128xf32>
    %227 = arith.mulf %226, %225 : vector<8x128xf32>
    %228 = math.tanh %227 : vector<8x128xf32>
    %cst_101 = arith.constant 1.000000e+00 : f32
    %229 = vector.broadcast %cst_101 : f32 to vector<8x128xf32>
    %230 = arith.addf %228, %229 : vector<8x128xf32>
    %cst_102 = arith.constant 5.000000e-01 : f32
    %231 = vector.broadcast %cst_102 : f32 to vector<8x128xf32>
    %232 = arith.mulf %231, %230 : vector<8x128xf32>
    %233 = vector.extract_strided_slice %224 {offsets = [0, 128], sizes = [8, 128], strides = [1, 1]} : vector<8x512xf32> to vector<8x128xf32>
    %cst_103 = arith.constant 5.000000e-01 : f32
    %234 = vector.broadcast %cst_103 : f32 to vector<8x128xf32>
    %235 = arith.mulf %234, %233 : vector<8x128xf32>
    %236 = math.tanh %235 : vector<8x128xf32>
    %cst_104 = arith.constant 1.000000e+00 : f32
    %237 = vector.broadcast %cst_104 : f32 to vector<8x128xf32>
    %238 = arith.addf %236, %237 : vector<8x128xf32>
    %cst_105 = arith.constant 5.000000e-01 : f32
    %239 = vector.broadcast %cst_105 : f32 to vector<8x128xf32>
    %240 = arith.mulf %239, %238 : vector<8x128xf32>
    %241 = vector.extract_strided_slice %224 {offsets = [0, 256], sizes = [8, 128], strides = [1, 1]} : vector<8x512xf32> to vector<8x128xf32>
    %242 = math.tanh %241 : vector<8x128xf32>
    %243 = vector.extract_strided_slice %224 {offsets = [0, 384], sizes = [8, 128], strides = [1, 1]} : vector<8x512xf32> to vector<8x128xf32>
    %cst_106 = arith.constant 5.000000e-01 : f32
    %244 = vector.broadcast %cst_106 : f32 to vector<8x128xf32>
    %245 = arith.mulf %244, %243 : vector<8x128xf32>
    %246 = math.tanh %245 : vector<8x128xf32>
    %cst_107 = arith.constant 1.000000e+00 : f32
    %247 = vector.broadcast %cst_107 : f32 to vector<8x128xf32>
    %248 = arith.addf %246, %247 : vector<8x128xf32>
    %cst_108 = arith.constant 5.000000e-01 : f32
    %249 = vector.broadcast %cst_108 : f32 to vector<8x128xf32>
    %250 = arith.mulf %249, %248 : vector<8x128xf32>
    %251 = arith.mulf %240, %212 : vector<8x128xf32>
    %252 = arith.mulf %232, %242 : vector<8x128xf32>
    %253 = arith.addf %251, %252 : vector<8x128xf32>
    %254 = math.tanh %253 : vector<8x128xf32>
    %255 = arith.mulf %250, %254 : vector<8x128xf32>
    %256 = arith.index_cast %c5_i32 : i32 to index
    %c0_109 = arith.constant 0 : index
    %c0_110 = arith.constant 0 : index
    %257 = vector.load %arg8[%256, %c0_109, %c0_110] : memref<8x8x128xf32, #tpu.memory_space<vmem>>, vector<1x8x128xf32>
    %258 = vector.shape_cast %257 : vector<1x8x128xf32> to vector<8x128xf32>
    %259 = vector.shape_cast %255 : vector<8x128xf32> to vector<1x8x128xf32>
    tpu.vector_store %arg8[%256, %c0_109, %c0_110], %259 {strides = array<i32>} : memref<8x8x128xf32, #tpu.memory_space<vmem>>, vector<1x8x128xf32>,
    %c6_i32 = arith.constant 6 : i32
    %260 = arith.index_cast %c6_i32 : i32 to index
    %c0_111 = arith.constant 0 : index
    %c0_112 = arith.constant 0 : index
    %261 = vector.load %arg11[%260, %c0_111, %c0_112] : memref<8x8x512xf32, #tpu.memory_space<vmem>>, vector<1x8x512xf32>
    %262 = vector.shape_cast %261 : vector<1x8x512xf32> to vector<8x512xf32>
    %c0_113 = arith.constant 0 : index
    %c0_114 = arith.constant 0 : index
    %263 = vector.load %arg6[%c0_113, %c0_114] : memref<128x512xf32, #tpu.memory_space<vmem>>, vector<128x512xf32>
    %cst_115 = arith.constant dense<0.000000e+00> : vector<8x512xf32>
    %264 = tpu.matmul %255, %263, %cst_115 {dimension_numbers = #tpu.dot_dimension_numbers<[1], [0], [0], [1], [0, 0, 1, 1], [], []>} : vector<8x128xf32>, vector<128x512xf32>, vector<8x512xf32> -> vector<8x512xf32>
    %265 = arith.addf %262, %264 : vector<8x512xf32>
    %266 = vector.extract_strided_slice %265 {offsets = [0, 0], sizes = [8, 128], strides = [1, 1]} : vector<8x512xf32> to vector<8x128xf32>
    %cst_116 = arith.constant 5.000000e-01 : f32
    %267 = vector.broadcast %cst_116 : f32 to vector<8x128xf32>
    %268 = arith.mulf %267, %266 : vector<8x128xf32>
    %269 = math.tanh %268 : vector<8x128xf32>
    %cst_117 = arith.constant 1.000000e+00 : f32
    %270 = vector.broadcast %cst_117 : f32 to vector<8x128xf32>
    %271 = arith.addf %269, %270 : vector<8x128xf32>
    %cst_118 = arith.constant 5.000000e-01 : f32
    %272 = vector.broadcast %cst_118 : f32 to vector<8x128xf32>
    %273 = arith.mulf %272, %271 : vector<8x128xf32>
    %274 = vector.extract_strided_slice %265 {offsets = [0, 128], sizes = [8, 128], strides = [1, 1]} : vector<8x512xf32> to vector<8x128xf32>
    %cst_119 = arith.constant 5.000000e-01 : f32
    %275 = vector.broadcast %cst_119 : f32 to vector<8x128xf32>
    %276 = arith.mulf %275, %274 : vector<8x128xf32>
    %277 = math.tanh %276 : vector<8x128xf32>
    %cst_120 = arith.constant 1.000000e+00 : f32
    %278 = vector.broadcast %cst_120 : f32 to vector<8x128xf32>
    %279 = arith.addf %277, %278 : vector<8x128xf32>
    %cst_121 = arith.constant 5.000000e-01 : f32
    %280 = vector.broadcast %cst_121 : f32 to vector<8x128xf32>
    %281 = arith.mulf %280, %279 : vector<8x128xf32>
    %282 = vector.extract_strided_slice %265 {offsets = [0, 256], sizes = [8, 128], strides = [1, 1]} : vector<8x512xf32> to vector<8x128xf32>
    %283 = math.tanh %282 : vector<8x128xf32>
    %284 = vector.extract_strided_slice %265 {offsets = [0, 384], sizes = [8, 128], strides = [1, 1]} : vector<8x512xf32> to vector<8x128xf32>
    %cst_122 = arith.constant 5.000000e-01 : f32
    %285 = vector.broadcast %cst_122 : f32 to vector<8x128xf32>
    %286 = arith.mulf %285, %284 : vector<8x128xf32>
    %287 = math.tanh %286 : vector<8x128xf32>
    %cst_123 = arith.constant 1.000000e+00 : f32
    %288 = vector.broadcast %cst_123 : f32 to vector<8x128xf32>
    %289 = arith.addf %287, %288 : vector<8x128xf32>
    %cst_124 = arith.constant 5.000000e-01 : f32
    %290 = vector.broadcast %cst_124 : f32 to vector<8x128xf32>
    %291 = arith.mulf %290, %289 : vector<8x128xf32>
    %292 = arith.mulf %281, %253 : vector<8x128xf32>
    %293 = arith.mulf %273, %283 : vector<8x128xf32>
    %294 = arith.addf %292, %293 : vector<8x128xf32>
    %295 = math.tanh %294 : vector<8x128xf32>
    %296 = arith.mulf %291, %295 : vector<8x128xf32>
    %297 = arith.index_cast %c6_i32 : i32 to index
    %c0_125 = arith.constant 0 : index
    %c0_126 = arith.constant 0 : index
    %298 = vector.load %arg8[%297, %c0_125, %c0_126] : memref<8x8x128xf32, #tpu.memory_space<vmem>>, vector<1x8x128xf32>
    %299 = vector.shape_cast %298 : vector<1x8x128xf32> to vector<8x128xf32>
    %300 = vector.shape_cast %296 : vector<8x128xf32> to vector<1x8x128xf32>
    tpu.vector_store %arg8[%297, %c0_125, %c0_126], %300 {strides = array<i32>} : memref<8x8x128xf32, #tpu.memory_space<vmem>>, vector<1x8x128xf32>,
    %c7_i32 = arith.constant 7 : i32
    %301 = arith.index_cast %c7_i32 : i32 to index
    %c0_127 = arith.constant 0 : index
    %c0_128 = arith.constant 0 : index
    %302 = vector.load %arg11[%301, %c0_127, %c0_128] : memref<8x8x512xf32, #tpu.memory_space<vmem>>, vector<1x8x512xf32>
    %303 = vector.shape_cast %302 : vector<1x8x512xf32> to vector<8x512xf32>
    %c0_129 = arith.constant 0 : index
    %c0_130 = arith.constant 0 : index
    %304 = vector.load %arg6[%c0_129, %c0_130] : memref<128x512xf32, #tpu.memory_space<vmem>>, vector<128x512xf32>
    %cst_131 = arith.constant dense<0.000000e+00> : vector<8x512xf32>
    %305 = tpu.matmul %296, %304, %cst_131 {dimension_numbers = #tpu.dot_dimension_numbers<[1], [0], [0], [1], [0, 0, 1, 1], [], []>} : vector<8x128xf32>, vector<128x512xf32>, vector<8x512xf32> -> vector<8x512xf32>
    %306 = arith.addf %303, %305 : vector<8x512xf32>
    %307 = vector.extract_strided_slice %306 {offsets = [0, 0], sizes = [8, 128], strides = [1, 1]} : vector<8x512xf32> to vector<8x128xf32>
    %cst_132 = arith.constant 5.000000e-01 : f32
    %308 = vector.broadcast %cst_132 : f32 to vector<8x128xf32>
    %309 = arith.mulf %308, %307 : vector<8x128xf32>
    %310 = math.tanh %309 : vector<8x128xf32>
    %cst_133 = arith.constant 1.000000e+00 : f32
    %311 = vector.broadcast %cst_133 : f32 to vector<8x128xf32>
    %312 = arith.addf %310, %311 : vector<8x128xf32>
    %cst_134 = arith.constant 5.000000e-01 : f32
    %313 = vector.broadcast %cst_134 : f32 to vector<8x128xf32>
    %314 = arith.mulf %313, %312 : vector<8x128xf32>
    %315 = vector.extract_strided_slice %306 {offsets = [0, 128], sizes = [8, 128], strides = [1, 1]} : vector<8x512xf32> to vector<8x128xf32>
    %cst_135 = arith.constant 5.000000e-01 : f32
    %316 = vector.broadcast %cst_135 : f32 to vector<8x128xf32>
    %317 = arith.mulf %316, %315 : vector<8x128xf32>
    %318 = math.tanh %317 : vector<8x128xf32>
    %cst_136 = arith.constant 1.000000e+00 : f32
    %319 = vector.broadcast %cst_136 : f32 to vector<8x128xf32>
    %320 = arith.addf %318, %319 : vector<8x128xf32>
    %cst_137 = arith.constant 5.000000e-01 : f32
    %321 = vector.broadcast %cst_137 : f32 to vector<8x128xf32>
    %322 = arith.mulf %321, %320 : vector<8x128xf32>
    %323 = vector.extract_strided_slice %306 {offsets = [0, 256], sizes = [8, 128], strides = [1, 1]} : vector<8x512xf32> to vector<8x128xf32>
    %324 = math.tanh %323 : vector<8x128xf32>
    %325 = vector.extract_strided_slice %306 {offsets = [0, 384], sizes = [8, 128], strides = [1, 1]} : vector<8x512xf32> to vector<8x128xf32>
    %cst_138 = arith.constant 5.000000e-01 : f32
    %326 = vector.broadcast %cst_138 : f32 to vector<8x128xf32>
    %327 = arith.mulf %326, %325 : vector<8x128xf32>
    %328 = math.tanh %327 : vector<8x128xf32>
    %cst_139 = arith.constant 1.000000e+00 : f32
    %329 = vector.broadcast %cst_139 : f32 to vector<8x128xf32>
    %330 = arith.addf %328, %329 : vector<8x128xf32>
    %cst_140 = arith.constant 5.000000e-01 : f32
    %331 = vector.broadcast %cst_140 : f32 to vector<8x128xf32>
    %332 = arith.mulf %331, %330 : vector<8x128xf32>
    %333 = arith.mulf %322, %294 : vector<8x128xf32>
    %334 = arith.mulf %314, %324 : vector<8x128xf32>
    %335 = arith.addf %333, %334 : vector<8x128xf32>
    %336 = math.tanh %335 : vector<8x128xf32>
    %337 = arith.mulf %332, %336 : vector<8x128xf32>
    %338 = arith.index_cast %c7_i32 : i32 to index
    %c0_141 = arith.constant 0 : index
    %c0_142 = arith.constant 0 : index
    %339 = vector.load %arg8[%338, %c0_141, %c0_142] : memref<8x8x128xf32, #tpu.memory_space<vmem>>, vector<1x8x128xf32>
    %340 = vector.shape_cast %339 : vector<1x8x128xf32> to vector<8x128xf32>
    %341 = vector.shape_cast %337 : vector<8x128xf32> to vector<1x8x128xf32>
    tpu.vector_store %arg8[%338, %c0_141, %c0_142], %341 {strides = array<i32>} : memref<8x8x128xf32, #tpu.memory_space<vmem>>, vector<1x8x128xf32>,
    %c8_i32 = arith.constant 8 : i32
    %c0_143 = arith.constant 0 : index
    %c0_144 = arith.constant 0 : index
    %342 = vector.load %arg12[%c0_143, %c0_144] : memref<8x128xf32, #tpu.memory_space<vmem>>, vector<8x128xf32>
    tpu.vector_store %arg12[%c0_143, %c0_144], %337 {strides = array<i32>} : memref<8x128xf32, #tpu.memory_space<vmem>>, vector<8x128xf32>,
    %c0_145 = arith.constant 0 : index
    %c0_146 = arith.constant 0 : index
    %343 = vector.load %arg13[%c0_145, %c0_146] : memref<8x128xf32, #tpu.memory_space<vmem>>, vector<8x128xf32>
    tpu.vector_store %arg13[%c0_145, %c0_146], %335 {strides = array<i32>} : memref<8x128xf32, #tpu.memory_space<vmem>>, vector<8x128xf32>,
    %c0_i32_147 = arith.constant 0 : i32
    %344 = arith.cmpi eq, %arg1, %c0_i32_147 : i32
    %345 = arith.extui %344 : i1 to i32
    %c0_i32_148 = arith.constant 0 : i32
    %346 = arith.cmpi ne, %345, %c0_i32_148 : i32
    scf.if %346 {
      %c0_149 = arith.constant 0 : index
      %c0_150 = arith.constant 0 : index
      %347 = vector.load %arg9[%c0_149, %c0_150] : memref<8x128xf32, #tpu.memory_space<vmem>>, vector<8x128xf32>
      tpu.vector_store %arg9[%c0_149, %c0_150], %337 {strides = array<i32>} : memref<8x128xf32, #tpu.memory_space<vmem>>, vector<8x128xf32>,
      %c0_151 = arith.constant 0 : index
      %c0_152 = arith.constant 0 : index
      %348 = vector.load %arg10[%c0_151, %c0_152] : memref<8x128xf32, #tpu.memory_space<vmem>>, vector<8x128xf32>
      tpu.vector_store %arg10[%c0_151, %c0_152], %335 {strides = array<i32>} : memref<8x128xf32, #tpu.memory_space<vmem>>, vector<8x128xf32>,
    } else {
    }
    return
  }
  func.func @transform_0(%arg0: i32, %arg1: i32) -> (i32, i32, i32) {
    %c0_i32 = arith.constant 0 : i32
    %c0_i32_0 = arith.constant 0 : i32
    return %arg1, %arg0, %c0_i32 : i32, i32, i32
  }
  func.func @transform_1(%arg0: i32, %arg1: i32) -> (i32, i32) {
    %c0_i32 = arith.constant 0 : i32
    %c0_i32_0 = arith.constant 0 : i32
    return %arg0, %c0_i32 : i32, i32
  }
  func.func @transform_2(%arg0: i32, %arg1: i32) -> (i32, i32) {
    %c0_i32 = arith.constant 0 : i32
    %c0_i32_0 = arith.constant 0 : i32
    return %arg0, %c0_i32 : i32, i32
  }
  func.func @transform_3(%arg0: i32, %arg1: i32) -> (i32, i32) {
    %c0_i32 = arith.constant 0 : i32
    %c0_i32_0 = arith.constant 0 : i32
    %c0_i32_1 = arith.constant 0 : i32
    return %c0_i32, %c0_i32_0 : i32, i32
  }
  func.func @transform_4(%arg0: i32, %arg1: i32) -> (i32, i32) {
    %c0_i32 = arith.constant 0 : i32
    %c0_i32_0 = arith.constant 0 : i32
    %c0_i32_1 = arith.constant 0 : i32
    return %c0_i32, %c0_i32_0 : i32, i32
  }
  func.func @transform_5(%arg0: i32, %arg1: i32) -> (i32, i32) {
    %c0_i32 = arith.constant 0 : i32
    %c0_i32_0 = arith.constant 0 : i32
    %c0_i32_1 = arith.constant 0 : i32
    return %c0_i32, %c0_i32_0 : i32, i32
  }
  func.func @transform_6(%arg0: i32, %arg1: i32) -> (i32, i32, i32) {
    %c0_i32 = arith.constant 0 : i32
    %c0_i32_0 = arith.constant 0 : i32
    return %arg1, %arg0, %c0_i32 : i32, i32, i32
  }
  func.func @transform_7(%arg0: i32, %arg1: i32) -> (i32, i32) {
    %c0_i32 = arith.constant 0 : i32
    %c0_i32_0 = arith.constant 0 : i32
    return %arg0, %c0_i32 : i32, i32
  }
  func.func @transform_8(%arg0: i32, %arg1: i32) -> (i32, i32) {
    %c0_i32 = arith.constant 0 : i32
    %c0_i32_0 = arith.constant 0 : i32
    return %arg0, %c0_i32 : i32, i32
  }
}

</mosaic_0001>

<bundles_post_ra>
// kernel: dp_lstm_layer_forward.1
= control target key start
LH: loop header
LB: loop body
LE: loop exit
PB: predicated region body
PF: predicated region fallthrough
CT: control target
= control target key end

     0   :  { %v4135_v3 = vmov 0.0   ;;  %s4126_s3 = inlined_call_operand.vmem [shape: f32[128,512], index: 3, kind: input, shape index: {}]   ;;  %s4127_s0 = inlined_call_operand.vmem [shape: f32[8,8,128], index: 0, kind: input, shape index: {}]   ;;  %s4128_s4 = inlined_call_operand.vmem [shape: f32[128,512], index: 4, kind: input, shape index: {}]   ;;  %s4129_s1 = inlined_call_operand.vmem [shape: f32[8,128], index: 1, kind: input, shape index: {}]   ;;  %s4130_s5 = inlined_call_operand.vmem [shape: f32[1,512], index: 5, kind: input, shape index: {}]   ;;  %s4131_s2 = inlined_call_operand.vmem [shape: f32[8,128], index: 2, kind: input, shape index: {}]   ;;  %s4132_s6 = inlined_call_operand.vmem [shape: f32[8,8,128], index: 6, kind: output, shape index: {0}]   ;;  %s4133_s8 = inlined_call_operand.vmem [shape: f32[8,128], index: 8, kind: output, shape index: {2}]   ;;  %s4134_s7 = inlined_call_operand.vmem [shape: f32[8,128], index: 7, kind: output, shape index: {1}]  }
   0x1   :  { %v103_v0 = vld [vmem:[%s4126_s3 + $0x1e8] sm:$0xff]  ;;  %v105_v1 = vld [vmem:[%s4126_s3 + $0x1f8] sm:$0xff]  ;;  %v102_v2 = vld [vmem:[%s4126_s3 + $0x1e0] sm:$0xff]  ;;  %192 = vmatprep.mubr.f32.mxu0 %v4135_v3  ;;  %305 = vmatprep.mubr.f32.mxu1 %v4135_v3 }
   0x2   :  { %128 = vmatprep.subr.mxu0 %v103_v0  ;;  %241 = vmatprep.subr.mxu1 %v105_v1  ;;  %v104_v4 = vld [vmem:[%s4126_s3 + $0x1f0] sm:$0xff]  ;;  %v99_v5 = vld [vmem:[%s4126_s3 + $0x1c8] sm:$0xff]  ;;  %v101_v6 = vld [vmem:[%s4126_s3 + $0x1d8] sm:$0xff] }
   0x3   :  { %129 = vmatpush1.msra.mxu0 %v102_v2  ;;  %242 = vmatpush1.msra.mxu1 %v104_v4  ;;  %v98_v7 = vld [vmem:[%s4126_s3 + $0x1c0] sm:$0xff]  ;;  %v100_v8 = vld [vmem:[%s4126_s3 + $0x1d0] sm:$0xff]  ;;  %v95_v9 = vld [vmem:[%s4126_s3 + $0x1a8] sm:$0xff] }
   0x4   :  { %130 = vmatprep.subr.mxu0 %v99_v5  ;;  %243 = vmatprep.subr.mxu1 %v101_v6  ;;  %v97_v10 = vld [vmem:[%s4126_s3 + $0x1b8] sm:$0xff]  ;;  %v94_v11 = vld [vmem:[%s4126_s3 + $0x1a0] sm:$0xff]  ;;  %v96_v12 = vld [vmem:[%s4126_s3 + $0x1b0] sm:$0xff] }
   0x5   :  { %131 = vmatpush1.msra.mxu0 %v98_v7  ;;  %244 = vmatpush1.msra.mxu1 %v100_v8  ;;  %v91_v13 = vld [vmem:[%s4126_s3 + $0x188] sm:$0xff]  ;;  %v93_v14 = vld [vmem:[%s4126_s3 + $0x198] sm:$0xff]  ;;  %v90_v15 = vld [vmem:[%s4126_s3 + $0x180] sm:$0xff] }
   0x6   :  { %132 = vmatprep.subr.mxu0 %v95_v9  ;;  %245 = vmatprep.subr.mxu1 %v97_v10  ;;  %v92_v16 = vld [vmem:[%s4126_s3 + $0x190] sm:$0xff]  ;;  %v87_v17 = vld [vmem:[%s4126_s3 + $0x168] sm:$0xff]  ;;  %v89_v18 = vld [vmem:[%s4126_s3 + $0x178] sm:$0xff] }
   0x7   :  { %133 = vmatpush1.msra.mxu0 %v94_v11  ;;  %246 = vmatpush1.msra.mxu1 %v96_v12  ;;  %v86_v19 = vld [vmem:[%s4126_s3 + $0x160] sm:$0xff]  ;;  %v88_v20 = vld [vmem:[%s4126_s3 + $0x170] sm:$0xff]  ;;  %v83_v21 = vld [vmem:[%s4126_s3 + $0x148] sm:$0xff] }
   0x8   :  { %134 = vmatprep.subr.mxu0 %v91_v13  ;;  %247 = vmatprep.subr.mxu1 %v93_v14  ;;  %v85_v22 = vld [vmem:[%s4126_s3 + $0x158] sm:$0xff]  ;;  %v82_v23 = vld [vmem:[%s4126_s3 + $0x140] sm:$0xff]  ;;  %v84_v24 = vld [vmem:[%s4126_s3 + $0x150] sm:$0xff] }
   0x9   :  { %135 = vmatpush1.msra.mxu0 %v90_v15  ;;  %248 = vmatpush1.msra.mxu1 %v92_v16  ;;  %v79_v25 = vld [vmem:[%s4126_s3 + $0x128] sm:$0xff]  ;;  %v81_v26 = vld [vmem:[%s4126_s3 + $0x138] sm:$0xff]  ;;  %v78_v27 = vld [vmem:[%s4126_s3 + $0x120] sm:$0xff] }
   0xa   :  { %136 = vmatprep.subr.mxu0 %v87_v17  ;;  %249 = vmatprep.subr.mxu1 %v89_v18  ;;  %v80_v28 = vld [vmem:[%s4126_s3 + $0x130] sm:$0xff]  ;;  %v75_v29 = vld [vmem:[%s4126_s3 + $0x108] sm:$0xff]  ;;  %v77_v30 = vld [vmem:[%s4126_s3 + $0x118] sm:$0xff] }
   0xb   :  { %137 = vmatpush1.msra.mxu0 %v86_v19  ;;  %250 = vmatpush1.msra.mxu1 %v88_v20  ;;  %v74_v31 = vld [vmem:[%s4126_s3 + $0x100] sm:$0xff]  ;;  %v76_v32 = vld [vmem:[%s4126_s3 + $0x110] sm:$0xff]  ;;  %v71_v33 = vld [vmem:[%s4126_s3 + $0xe8] sm:$0xff] }
   0xc   :  { %138 = vmatprep.subr.mxu0 %v83_v21  ;;  %251 = vmatprep.subr.mxu1 %v85_v22  ;;  %v73_v34 = vld [vmem:[%s4126_s3 + $0xf8] sm:$0xff]  ;;  %v70_v35 = vld [vmem:[%s4126_s3 + $0xe0] sm:$0xff]  ;;  %v72_v36 = vld [vmem:[%s4126_s3 + $0xf0] sm:$0xff] }
   0xd   :  { %139 = vmatpush1.msra.mxu0 %v82_v23  ;;  %252 = vmatpush1.msra.mxu1 %v84_v24  ;;  %v67_v37 = vld [vmem:[%s4126_s3 + $0xc8] sm:$0xff]  ;;  %v69_v38 = vld [vmem:[%s4126_s3 + $0xd8] sm:$0xff]  ;;  %v66_v39 = vld [vmem:[%s4126_s3 + $0xc0] sm:$0xff] }
   0xe   :  { %140 = vmatprep.subr.mxu0 %v79_v25  ;;  %253 = vmatprep.subr.mxu1 %v81_v26  ;;  %v68_v40 = vld [vmem:[%s4126_s3 + $0xd0] sm:$0xff]  ;;  %v63_v41 = vld [vmem:[%s4126_s3 + $0xa8] sm:$0xff]  ;;  %v65_v42 = vld [vmem:[%s4126_s3 + $0xb8] sm:$0xff] }
   0xf   :  { %141 = vmatpush1.msra.mxu0 %v78_v27  ;;  %254 = vmatpush1.msra.mxu1 %v80_v28  ;;  %v62_v43 = vld [vmem:[%s4126_s3 + $0xa0] sm:$0xff]  ;;  %v64_v44 = vld [vmem:[%s4126_s3 + $0xb0] sm:$0xff]  ;;  %v59_v45 = vld [vmem:[%s4126_s3 + $0x88] sm:$0xff] }
  0x10   :  { %142 = vmatprep.subr.mxu0 %v75_v29  ;;  %255 = vmatprep.subr.mxu1 %v77_v30  ;;  %v61_v46 = vld [vmem:[%s4126_s3 + $0x98] sm:$0xff]  ;;  %v58_v47 = vld [vmem:[%s4126_s3 + $0x80] sm:$0xff]  ;;  %v60_v48 = vld [vmem:[%s4126_s3 + $0x90] sm:$0xff] }
  0x11   :  { %143 = vmatpush1.msra.mxu0 %v74_v31  ;;  %256 = vmatpush1.msra.mxu1 %v76_v32  ;;  %v55_v49 = vld [vmem:[%s4126_s3 + $0x68] sm:$0xff]  ;;  %v57_v50 = vld [vmem:[%s4126_s3 + $0x78] sm:$0xff]  ;;  %v54_v51 = vld [vmem:[%s4126_s3 + $0x60] sm:$0xff] }
  0x12   :  { %144 = vmatprep.subr.mxu0 %v71_v33  ;;  %257 = vmatprep.subr.mxu1 %v73_v34  ;;  %v56_v52 = vld [vmem:[%s4126_s3 + $0x70] sm:$0xff]  ;;  %v51_v53 = vld [vmem:[%s4126_s3 + $0x48] sm:$0xff]  ;;  %v53_v54 = vld [vmem:[%s4126_s3 + $0x58] sm:$0xff] }
  0x13   :  { %145 = vmatpush1.msra.mxu0 %v70_v35  ;;  %258 = vmatpush1.msra.mxu1 %v72_v36  ;;  %v50_v55 = vld [vmem:[%s4126_s3 + $0x40] sm:$0xff]  ;;  %v52_v56 = vld [vmem:[%s4126_s3 + $0x50] sm:$0xff]  ;;  %v47_v57 = vld [vmem:[%s4126_s3 + $0x28] sm:$0xff] }
  0x14   :  { %146 = vmatprep.subr.mxu0 %v67_v37  ;;  %259 = vmatprep.subr.mxu1 %v69_v38  ;;  %v49_v58 = vld [vmem:[%s4126_s3 + $0x38] sm:$0xff]  ;;  %v46_v59 = vld [vmem:[%s4126_s3 + $0x20] sm:$0xff]  ;;  %v48_v60 = vld [vmem:[%s4126_s3 + $0x30] sm:$0xff] }
  0x15   :  { %147 = vmatpush1.msra.mxu0 %v66_v39  ;;  %260 = vmatpush1.msra.mxu1 %v68_v40  ;;  %v43_v61 = vld [vmem:[%s4126_s3 + $0x8] sm:$0xff]  ;;  %v45_v62 = vld [vmem:[%s4126_s3 + $0x18] sm:$0xff]  ;;  %v42_v63 = vld [vmem:[%s4126_s3] sm:$0xff] }
  0x16   :  { %148 = vmatprep.subr.mxu0 %v63_v41  ;;  %261 = vmatprep.subr.mxu1 %v65_v42  ;;  %v44_v0 = vld [vmem:[%s4126_s3 + $0x10] sm:$0xff]  ;;  %v34_v1 = vld [vmem:[%s4127_s0] sm:$0xff]  ;;  %v2619_v2 = vld [vmem:[%s4128_s4 + $0x1e8] sm:$0xff] }
  0x17   :  { %149 = vmatpush1.msra.mxu0 %v62_v43  ;;  %262 = vmatpush1.msra.mxu1 %v64_v44  ;;  %v2624_v4 = vld [vmem:[%s4128_s4 + $0x1f8] sm:$0xff]  ;;  %v2629_v5 = vld [vmem:[%s4128_s4 + $0x1e0] sm:$0xff]  ;;  %v2634_v6 = vld [vmem:[%s4128_s4 + $0x1f0] sm:$0xff] }
  0x18   :  { %150 = vmatprep.subr.mxu0 %v59_v45  ;;  %263 = vmatprep.subr.mxu1 %v61_v46  ;;  %v2639_v7 = vld [vmem:[%s4128_s4 + $0x1c8] sm:$0xff]  ;;  %v2644_v8 = vld [vmem:[%s4128_s4 + $0x1d8] sm:$0xff]  ;;  %v2653_v9 = vld [vmem:[%s4128_s4 + $0x1c0] sm:$0xff] }
  0x19   :  { %151 = vmatpush1.msra.mxu0 %v58_v47  ;;  %264 = vmatpush1.msra.mxu1 %v60_v48  ;;  %v2658_v10 = vld [vmem:[%s4128_s4 + $0x1d0] sm:$0xff]  ;;  %v35_v11 = vld [vmem:[%s4127_s0 + $0x8] sm:$0xff]  ;;  %v2675_v13 = vld [vmem:[%s4128_s4 + $0x1b8] sm:$0xff] }
  0x1a   :  { %152 = vmatprep.subr.mxu0 %v55_v49  ;;  %265 = vmatprep.subr.mxu1 %v57_v50  ;;  %v2670_v12 = vld [vmem:[%s4128_s4 + $0x1a8] sm:$0xff]  ;;  %v2682_v14 = vld [vmem:[%s4128_s4 + $0x1a0] sm:$0xff]  ;;  %v2687_v15 = vld [vmem:[%s4128_s4 + $0x1b0] sm:$0xff] }
  0x1b   :  { %153 = vmatpush1.msra.mxu0 %v54_v51  ;;  %266 = vmatpush1.msra.mxu1 %v56_v52  ;;  %v2692_v16 = vld [vmem:[%s4128_s4 + $0x188] sm:$0xff]  ;;  %v2697_v17 = vld [vmem:[%s4128_s4 + $0x198] sm:$0xff]  ;;  %v2706_v18 = vld [vmem:[%s4128_s4 + $0x180] sm:$0xff] }
  0x1c   :  { %154 = vmatprep.subr.mxu0 %v51_v53  ;;  %267 = vmatprep.subr.mxu1 %v53_v54  ;;  %v2711_v19 = vld [vmem:[%s4128_s4 + $0x190] sm:$0xff]  ;;  %v2723_v21 = vld [vmem:[%s4128_s4 + $0x168] sm:$0xff]  ;;  %v2728_v22 = vld [vmem:[%s4128_s4 + $0x178] sm:$0xff] }
  0x1d   :  { %155 = vmatpush1.msra.mxu0 %v50_v55  ;;  %268 = vmatpush1.msra.mxu1 %v52_v56  ;;  %v36_v20 = vld [vmem:[%s4127_s0 + $0x10] sm:$0xff]  ;;  %v2735_v23 = vld [vmem:[%s4128_s4 + $0x160] sm:$0xff]  ;;  %v2745_v25 = vld [vmem:[%s4128_s4 + $0x148] sm:$0xff] }
  0x1e   :  { %156 = vmatprep.subr.mxu0 %v47_v57  ;;  %269 = vmatprep.subr.mxu1 %v49_v58  ;;  %v2740_v24 = vld [vmem:[%s4128_s4 + $0x170] sm:$0xff]  ;;  %v2750_v26 = vld [vmem:[%s4128_s4 + $0x158] sm:$0xff]  ;;  %v2759_v27 = vld [vmem:[%s4128_s4 + $0x140] sm:$0xff] }
  0x1f   :  { %157 = vmatpush1.msra.mxu0 %v46_v59  ;;  %270 = vmatpush1.msra.mxu1 %v48_v60  ;;  %v2764_v28 = vld [vmem:[%s4128_s4 + $0x150] sm:$0xff]  ;;  %v37_v29 = vld [vmem:[%s4127_s0 + $0x18] sm:$0xff]  ;;  %v2776_v30 = vld [vmem:[%s4128_s4 + $0x128] sm:$0xff] }
  0x20   :  { %158 = vmatprep.subr.mxu0 %v43_v61  ;;  %271 = vmatprep.subr.mxu1 %v45_v62  ;;  %v2781_v31 = vld [vmem:[%s4128_s4 + $0x138] sm:$0xff]  ;;  %v2788_v32 = vld [vmem:[%s4128_s4 + $0x120] sm:$0xff]  ;;  %v2793_v33 = vld [vmem:[%s4128_s4 + $0x130] sm:$0xff] }
  0x21   :  { %159 = vmatpush1.msra.mxu0 %v42_v63  ;;  %272 = vmatpush1.msra.mxu1 %v44_v0  ;;  %v2798_v34 = vld [vmem:[%s4128_s4 + $0x108] sm:$0xff]  ;;  %v2803_v35 = vld [vmem:[%s4128_s4 + $0x118] sm:$0xff]  ;;  %v2812_v36 = vld [vmem:[%s4128_s4 + $0x100] sm:$0xff] }
  0x22   :  { %193 = vmatmul.mubr.f32.vlgmr.msra.gmra.mxu0 %v34_v1  ;;  %306 = vmatmul.mubr.f32.vlgmr.msra.gmra.mxu1 %v34_v1  ;;  %v2817_v37 = vld [vmem:[%s4128_s4 + $0x110] sm:$0xff]  ;;  %v38_v38 = vld [vmem:[%s4127_s0 + $0x20] sm:$0xff]  ;;  %v2829_v39 = vld [vmem:[%s4128_s4 + $0xe8] sm:$0xff] }
  0x23   :  { %456 = vmatprep.subr.mxu0 %v2619_v2  ;;  %527 = vmatprep.subr.mxu1 %v2624_v4  ;;  %v2834_v40 = vld [vmem:[%s4128_s4 + $0xf8] sm:$0xff]  ;;  %v2841_v41 = vld [vmem:[%s4128_s4 + $0xe0] sm:$0xff]  ;;  %v2846_v42 = vld [vmem:[%s4128_s4 + $0xf0] sm:$0xff] }
  0x24   :  { %457 = vmatpush1.msra.mxu0 %v2629_v5  ;;  %528 = vmatpush1.msra.mxu1 %v2634_v6  ;;  %v2851_v43 = vld [vmem:[%s4128_s4 + $0xc8] sm:$0xff]  ;;  %v2856_v44 = vld [vmem:[%s4128_s4 + $0xd8] sm:$0xff]  ;;  %v2865_v45 = vld [vmem:[%s4128_s4 + $0xc0] sm:$0xff] }
  0x25   :  { %458 = vmatprep.subr.mxu0 %v2639_v7  ;;  %529 = vmatprep.subr.mxu1 %v2644_v8  ;;  %v2870_v46 = vld [vmem:[%s4128_s4 + $0xd0] sm:$0xff]  ;;  %v39_v47 = vld [vmem:[%s4127_s0 + $0x28] sm:$0xff]  ;;  %v2887_v49 = vld [vmem:[%s4128_s4 + $0xb8] sm:$0xff] }
  0x26   :  { %198 = vmatprep.mubr.f32.mxu0 %v4135_v3  ;;  %311 = vmatprep.mubr.f32.mxu1 %v4135_v3  ;;  %v2882_v48 = vld [vmem:[%s4128_s4 + $0xa8] sm:$0xff]  ;;  %v2894_v50 = vld [vmem:[%s4128_s4 + $0xa0] sm:$0xff]  ;;  %v2899_v51 = vld [vmem:[%s4128_s4 + $0xb0] sm:$0xff] }
  0x27   :  { %459 = vmatpush1.msra.mxu0 %v2653_v9  ;;  %530 = vmatpush1.msra.mxu1 %v2658_v10  ;;  %v2904_v52 = vld [vmem:[%s4128_s4 + $0x88] sm:$0xff]  ;;  %v2909_v53 = vld [vmem:[%s4128_s4 + $0x98] sm:$0xff]  ;;  %v2918_v54 = vld [vmem:[%s4128_s4 + $0x80] sm:$0xff] }
  0x28   :  { %199 = vmatmul.mubr.f32.gmra.mxu0 %v35_v11  ;;  %312 = vmatmul.mubr.f32.gmra.mxu1 %v35_v11  ;;  %4205 = vst [vmem:[#allocation5_spill] sm:$0xff] %v2904_v52  ;;  %4206 = vst [vmem:[#allocation6_spill] sm:$0xff] %v2909_v53  ;;  %v2923_v55 = vld [vmem:[%s4128_s4 + $0x90] sm:$0xff]  ;;  %v2935_v57 = vld [vmem:[%s4128_s4 + $0x68] sm:$0xff] }
  0x29   :  { %460 = vmatprep.subr.mxu0 %v2670_v12  ;;  %531 = vmatprep.subr.mxu1 %v2675_v13  ;;  %4207 = vst [vmem:[#allocation7_spill] sm:$0xff] %v2918_v54  ;;  %4208 = vst [vmem:[#allocation8_spill] sm:$0xff] %v2923_v55  ;;  %v40_v56 = vld [vmem:[%s4127_s0 + $0x30] sm:$0xff]  ;;  %v2940_v58 = vld [vmem:[%s4128_s4 + $0x78] sm:$0xff] }
  0x2a   :  { %461 = vmatpush1.msra.mxu0 %v2682_v14  ;;  %532 = vmatpush1.msra.mxu1 %v2687_v15  ;;  %4209 = vst [vmem:[#allocation9_spill] sm:$0xff] %v2935_v57  ;;  %4210 = vst [vmem:[#allocation10_spill] sm:$0xff] %v2940_v58  ;;  %v2947_v59 = vld [vmem:[%s4128_s4 + $0x60] sm:$0xff]  ;;  %v2952_v60 = vld [vmem:[%s4128_s4 + $0x70] sm:$0xff] }
  0x2b   :  { %462 = vmatprep.subr.mxu0 %v2692_v16  ;;  %533 = vmatprep.subr.mxu1 %v2697_v17  ;;  %4211 = vst [vmem:[#allocation11_spill] sm:$0xff] %v2947_v59  ;;  %4212 = vst [vmem:[#allocation12_spill] sm:$0xff] %v2952_v60  ;;  %v2957_v61 = vld [vmem:[%s4128_s4 + $0x48] sm:$0xff]  ;;  %v2962_v62 = vld [vmem:[%s4128_s4 + $0x58] sm:$0xff] }
  0x2c   :  { %204 = vmatprep.mubr.f32.mxu0 %v4135_v3  ;;  %317 = vmatprep.mubr.f32.mxu1 %v4135_v3  ;;  %4213 = vst [vmem:[#allocation13_spill] sm:$0xff] %v2957_v61  ;;  %4214 = vst [vmem:[#allocation14_spill] sm:$0xff] %v2962_v62  ;;  %v2971_v63 = vld [vmem:[%s4128_s4 + $0x40] sm:$0xff]  ;;  %v2976_v0 = vld [vmem:[%s4128_s4 + $0x50] sm:$0xff] }
  0x2d   :  { %463 = vmatpush1.msra.mxu0 %v2706_v18  ;;  %534 = vmatpush1.msra.mxu1 %v2711_v19  ;;  %4215 = vst [vmem:[#allocation15_spill] sm:$0xff] %v2971_v63  ;;  %4216 = vst [vmem:[#allocation16_spill] sm:$0xff] %v2976_v0  ;;  %v41_v1 = vld [vmem:[%s4127_s0 + $0x38] sm:$0xff]  ;;  %v2988_v11 = vld [vmem:[%s4128_s4 + $0x28] sm:$0xff] }
  0x2e   :  { %205 = vmatmul.mubr.f32.gmra.mxu0 %v36_v20  ;;  %318 = vmatmul.mubr.f32.gmra.mxu1 %v36_v20  ;;  %4217 = vst [vmem:[#allocation17_spill] sm:$0xff] %v2988_v11  ;;  %v2993_v20 = vld [vmem:[%s4128_s4 + $0x38] sm:$0xff] }
  0x2f   :  { %464 = vmatprep.subr.mxu0 %v2723_v21  ;;  %535 = vmatprep.subr.mxu1 %v2728_v22  ;;  %4218 = vst [vmem:[#allocation18_spill] sm:$0xff] %v2993_v20 }
  0x30   :  { %465 = vmatpush1.msra.mxu0 %v2735_v23  ;;  %536 = vmatpush1.msra.mxu1 %v2740_v24 }
  0x31   :  { %466 = vmatprep.subr.mxu0 %v2745_v25  ;;  %537 = vmatprep.subr.mxu1 %v2750_v26 }
  0x32   :  { %210 = vmatprep.mubr.f32.mxu0 %v4135_v3  ;;  %323 = vmatprep.mubr.f32.mxu1 %v4135_v3 }
  0x33   :  { %467 = vmatpush1.msra.mxu0 %v2759_v27  ;;  %538 = vmatpush1.msra.mxu1 %v2764_v28 }
  0x34   :  { %211 = vmatmul.mubr.f32.gmra.mxu0 %v37_v29  ;;  %324 = vmatmul.mubr.f32.gmra.mxu1 %v37_v29  ;;  %v3000_v29 = vld [vmem:[%s4128_s4 + $0x20] sm:$0xff] }
  0x35   :  { %468 = vmatprep.subr.mxu0 %v2776_v30  ;;  %539 = vmatprep.subr.mxu1 %v2781_v31  ;;  %4219 = vst [vmem:[#allocation19_spill] sm:$0xff] %v3000_v29 }
  0x36   :  { %469 = vmatpush1.msra.mxu0 %v2788_v32  ;;  %540 = vmatpush1.msra.mxu1 %v2793_v33 }
  0x37   :  { %470 = vmatprep.subr.mxu0 %v2798_v34  ;;  %541 = vmatprep.subr.mxu1 %v2803_v35 }
  0x38   :  { %216 = vmatprep.mubr.f32.mxu0 %v4135_v3  ;;  %329 = vmatprep.mubr.f32.mxu1 %v4135_v3 }
  0x39   :  { %471 = vmatpush1.msra.mxu0 %v2812_v36  ;;  %542 = vmatpush1.msra.mxu1 %v2817_v37 }
  0x3a   :  { %217 = vmatmul.mubr.f32.gmra.mxu0 %v38_v38  ;;  %330 = vmatmul.mubr.f32.gmra.mxu1 %v38_v38  ;;  %v3005_v38 = vld [vmem:[%s4128_s4 + $0x30] sm:$0xff] }
  0x3b   :  { %472 = vmatprep.subr.mxu0 %v2829_v39  ;;  %543 = vmatprep.subr.mxu1 %v2834_v40  ;;  %4220 = vst [vmem:[#allocation20_spill] sm:$0xff] %v3005_v38 }
  0x3c   :  { %473 = vmatpush1.msra.mxu0 %v2841_v41  ;;  %544 = vmatpush1.msra.mxu1 %v2846_v42 }
  0x3d   :  { %474 = vmatprep.subr.mxu0 %v2851_v43  ;;  %545 = vmatprep.subr.mxu1 %v2856_v44 }
  0x3e   :  { %222 = vmatprep.mubr.f32.mxu0 %v4135_v3  ;;  %335 = vmatprep.mubr.f32.mxu1 %v4135_v3 }
  0x3f   :  { %475 = vmatpush1.msra.mxu0 %v2865_v45  ;;  %546 = vmatpush1.msra.mxu1 %v2870_v46 }
  0x40   :  { %223 = vmatmul.mubr.f32.gmra.mxu0 %v39_v47  ;;  %336 = vmatmul.mubr.f32.gmra.mxu1 %v39_v47  ;;  %v3010_v47 = vld [vmem:[%s4128_s4 + $0x8] sm:$0xff] }
  0x41   :  { %476 = vmatprep.subr.mxu0 %v2882_v48  ;;  %547 = vmatprep.subr.mxu1 %v2887_v49  ;;  %4221 = vst [vmem:[#allocation21_spill] sm:$0xff] %v3010_v47 }
  0x42   :  { %477 = vmatpush1.msra.mxu0 %v2894_v50  ;;  %548 = vmatpush1.msra.mxu1 %v2899_v51 }
  0x43   :  { %478 = vmatprep.subr.mxu0 %v2904_v52  ;;  %549 = vmatprep.subr.mxu1 %v2909_v53 }
  0x44   :  { %228 = vmatprep.mubr.f32.mxu0 %v4135_v3  ;;  %341 = vmatprep.mubr.f32.mxu1 %v4135_v3 }
  0x45   :  { %479 = vmatpush1.msra.mxu0 %v2918_v54  ;;  %550 = vmatpush1.msra.mxu1 %v2923_v55 }
  0x46   :  { %229 = vmatmul.mubr.f32.gmra.mxu0 %v40_v56  ;;  %342 = vmatmul.mubr.f32.gmra.mxu1 %v40_v56  ;;  %v3015_v56 = vld [vmem:[%s4128_s4 + $0x18] sm:$0xff] }
  0x47   :  { %480 = vmatprep.subr.mxu0 %v2935_v57  ;;  %551 = vmatprep.subr.mxu1 %v2940_v58  ;;  %4222 = vst [vmem:[#allocation22_spill] sm:$0xff] %v3015_v56 }
  0x48   :  { %481 = vmatpush1.msra.mxu0 %v2947_v59  ;;  %552 = vmatpush1.msra.mxu1 %v2952_v60 }
  0x49   :  { %482 = vmatprep.subr.mxu0 %v2957_v61  ;;  %553 = vmatprep.subr.mxu1 %v2962_v62 }
  0x4a   :  { %234 = vmatprep.mubr.f32.mxu0 %v4135_v3  ;;  %347 = vmatprep.mubr.f32.mxu1 %v4135_v3  ;;  %v3022_v3 = vld [vmem:[%s4128_s4] sm:$0xff] }
  0x4b   :  { %483 = vmatpush1.msra.mxu0 %v2971_v63  ;;  %554 = vmatpush1.msra.mxu1 %v2976_v0  ;;  %4223 = vst [vmem:[#allocation23_spill] sm:$0xff] %v3022_v3 }
  0x4c   :  { %235 = vmatmul.mubr.f32.gmra.mxu0 %v41_v1  ;;  %348 = vmatmul.mubr.f32.gmra.mxu1 %v41_v1  ;;  %v3029_v1 = vld [vmem:[%s4128_s4 + $0x10] sm:$0xff] }
  0x4d   :  { %484 = vmatprep.subr.mxu0 %v2988_v11  ;;  %555 = vmatprep.subr.mxu1 %v2993_v20  ;;  %4224 = vst [vmem:[#allocation24_spill] sm:$0xff] %v3029_v1  ;;  %v30_v20 = vld [vmem:[%s4129_s1] sm:$0xff]  ;;  %v4225_v11 = vmov 0.0  }
  0x4e   :  { %485 = vmatpush1.msra.mxu0 %v3000_v29  ;;  %556 = vmatpush1.msra.mxu1 %v3005_v38 }
  0x4f   :  { %486 = vmatprep.subr.mxu0 %v3010_v47  ;;  %557 = vmatprep.subr.mxu1 %v3015_v56 }
  0x50   :  { %487 = vmatpush1.msra.mxu0 %v3022_v3  ;;  %520 = vmatprep.mubr.f32.mxu0 %v4225_v11 }
  0x51   :  { %558 = vmatpush1.msra.mxu1 %v3029_v1  ;;  %591 = vmatprep.mubr.f32.mxu1 %v4225_v11 }
  0x52   :  { %521 = vmatmul.mubr.f32.vlgmr.msra.gmra.mxu0 %v30_v20  ;;  %592 = vmatmul.mubr.f32.vlgmr.msra.gmra.mxu1 %v30_v20  ;;  %v4226_v20 = vld [vmem:[#allocation17_spill] sm:$0xff] }
  0x53   :  { %690 = vmatprep.subr.mxu0 %v2619_v2  ;;  %761 = vmatprep.subr.mxu1 %v2624_v4 }
  0x54   :  { %691 = vmatpush1.msra.mxu0 %v2629_v5  ;;  %762 = vmatpush1.msra.mxu1 %v2634_v6 }
  0x55   :  { %692 = vmatprep.subr.mxu0 %v2639_v7  ;;  %763 = vmatprep.subr.mxu1 %v2644_v8 }
  0x56   :  { %693 = vmatpush1.msra.mxu0 %v2653_v9  ;;  %764 = vmatpush1.msra.mxu1 %v2658_v10 }
  0x57   :  { %694 = vmatprep.subr.mxu0 %v2670_v12  ;;  %765 = vmatprep.subr.mxu1 %v2675_v13 }
  0x58   :  { %695 = vmatpush1.msra.mxu0 %v2682_v14  ;;  %766 = vmatpush1.msra.mxu1 %v2687_v15 }
  0x59   :  { %696 = vmatprep.subr.mxu0 %v2692_v16  ;;  %767 = vmatprep.subr.mxu1 %v2697_v17 }
  0x5a   :  { %697 = vmatpush1.msra.mxu0 %v2706_v18  ;;  %768 = vmatpush1.msra.mxu1 %v2711_v19 }
  0x5b   :  { %698 = vmatprep.subr.mxu0 %v2723_v21  ;;  %769 = vmatprep.subr.mxu1 %v2728_v22 }
  0x5c   :  { %699 = vmatpush1.msra.mxu0 %v2735_v23  ;;  %770 = vmatpush1.msra.mxu1 %v2740_v24 }
  0x5d   :  { %700 = vmatprep.subr.mxu0 %v2745_v25  ;;  %771 = vmatprep.subr.mxu1 %v2750_v26 }
  0x5e   :  { %701 = vmatpush1.msra.mxu0 %v2759_v27  ;;  %772 = vmatpush1.msra.mxu1 %v2764_v28 }
  0x5f   :  { %702 = vmatprep.subr.mxu0 %v2776_v30  ;;  %773 = vmatprep.subr.mxu1 %v2781_v31 }
  0x60   :  { %703 = vmatpush1.msra.mxu0 %v2788_v32  ;;  %774 = vmatpush1.msra.mxu1 %v2793_v33 }
  0x61   :  { %704 = vmatprep.subr.mxu0 %v2798_v34  ;;  %775 = vmatprep.subr.mxu1 %v2803_v35 }
  0x62   :  { %705 = vmatpush1.msra.mxu0 %v2812_v36  ;;  %776 = vmatpush1.msra.mxu1 %v2817_v37 }
  0x63   :  { %706 = vmatprep.subr.mxu0 %v2829_v39  ;;  %777 = vmatprep.subr.mxu1 %v2834_v40 }
  0x64   :  { %707 = vmatpush1.msra.mxu0 %v2841_v41  ;;  %778 = vmatpush1.msra.mxu1 %v2846_v42 }
  0x65   :  { %708 = vmatprep.subr.mxu0 %v2851_v43  ;;  %779 = vmatprep.subr.mxu1 %v2856_v44 }
  0x66   :  { %709 = vmatpush1.msra.mxu0 %v2865_v45  ;;  %780 = vmatpush1.msra.mxu1 %v2870_v46 }
  0x67   :  { %710 = vmatprep.subr.mxu0 %v2882_v48  ;;  %781 = vmatprep.subr.mxu1 %v2887_v49 }
  0x68   :  { %711 = vmatpush1.msra.mxu0 %v2894_v50  ;;  %782 = vmatpush1.msra.mxu1 %v2899_v51 }
  0x69   :  { %712 = vmatprep.subr.mxu0 %v2904_v52  ;;  %783 = vmatprep.subr.mxu1 %v2909_v53 }
  0x6a   :  { %713 = vmatpush1.msra.mxu0 %v2918_v54  ;;  %784 = vmatpush1.msra.mxu1 %v2923_v55  ;;  %v4227_v54 = vld [vmem:[#allocation18_spill] sm:$0xff] }
  0x6b   :  { %714 = vmatprep.subr.mxu0 %v2935_v57  ;;  %785 = vmatprep.subr.mxu1 %v2940_v58 }
  0x6c   :  { %715 = vmatpush1.msra.mxu0 %v2947_v59  ;;  %786 = vmatpush1.msra.mxu1 %v2952_v60 }
  0x6d   :  { %716 = vmatprep.subr.mxu0 %v2957_v61  ;;  %787 = vmatprep.subr.mxu1 %v2962_v62 }
  0x6e   :  { %717 = vmatpush1.msra.mxu0 %v2971_v63  ;;  %788 = vmatpush1.msra.mxu1 %v2976_v0 }
  0x6f   :  { %718 = vmatprep.subr.mxu0 %v4226_v20  ;;  %789 = vmatprep.subr.mxu1 %v4227_v54  ;;  %v108_v54 = vlaneseq }
  0x70   :  { %719 = vmatpush1.msra.mxu0 %v3000_v29  ;;  %790 = vmatpush1.msra.mxu1 %v3005_v38 }
  0x71   :  { %720 = vmatprep.subr.mxu0 %v3010_v47  ;;  %791 = vmatprep.subr.mxu1 %v3015_v56  ;;  %v109_v29 = vshrl.u32 %v108_v54, 7 }
  0x72   :  { %721 = vmatpush1.msra.mxu0 %v3022_v3  ;;  %754 = vmatprep.mubr.f32.mxu0 %v4225_v11  ;;  %v106_v3 = vld [vmem:[%s4130_s5] sm:$0xf] }
  0x73   :  { %792 = vmatpush1.msra.mxu1 %v3029_v1  ;;  %825 = vmatprep.mubr.f32.mxu1 %v4225_v11  ;;  %v110_v47 = vsub.s32 0, %v109_v29  ;;  %v118_v56 = vsub.s32 2, %v109_v29  ;;  %v114_v11 = vsub.s32 1, %v109_v29 }
  0x74   :  { %925 = vmatprep.subr.mxu0 %v2619_v2  ;;  %996 = vmatprep.subr.mxu1 %v2624_v4  ;;  %v122_v2 = vsub.s32 3, %v109_v29 }
  0x75   :  { %v111_v63 = vrot.slane %v106_v3, %v110_v47  ;;  %v3119_v4 = vrot.slane %v106_v3, %v118_v56  ;;  %v115_v61 = vrot.slane %v106_v3, %v114_v11 }
  0x76   :  { %v3121_v60 = vrot.slane %v106_v3, %v122_v2 }
  0xe2   :  { %v3108_v20 = vpop.f32.mrf.mxu0  ;;  %v3110_v38 = vpop.f32.mrf.mxu1 }
  0xe4   :  { %v3115_v0 = vpop.f32.mrf.mxu0  ;;  %v3117_v1 = vpop.f32.mrf.mxu1 }
  0xe8   :  { %v200_v54 = vpop.f32.mrf.mxu0  ;;  %v313_v62 = vpop.f32.mrf.mxu1 }
  0xe9   :  { %v3123_v59 = vadd.f32 %v200_v54, %v111_v63  ;;  %v3126_v58 = vadd.f32 %v313_v62, %v3119_v4 }
  0xea   :  { %v202_v57 = vpop.f32.mrf.mxu0  ;;  %v315_v55 = vpop.f32.mrf.mxu1 }
  0xeb   :  { %4228 = vst [vmem:[#allocation25_spill] sm:$0xff] %v3123_v59  ;;  %4229 = vst [vmem:[#allocation26_spill] sm:$0xff] %v3126_v58  ;;  %v3128_v53 = vadd.f32 %v202_v57, %v115_v61  ;;  %v3131_v52 = vadd.f32 %v315_v55, %v3121_v60 }
  0xed   :  { %4230 = vst [vmem:[#allocation27_spill] sm:$0xff] %v3128_v53  ;;  %4231 = vst [vmem:[#allocation28_spill] sm:$0xff] %v3131_v52 }
  0xee   :  { %v206_v29 = vpop.f32.mrf.mxu0  ;;  %v319_v47 = vpop.f32.mrf.mxu1 }
  0xef   :  { %v3133_v56 = vadd.f32 %v206_v29, %v111_v63  ;;  %v3136_v11 = vadd.f32 %v319_v47, %v3119_v4 }
  0xf0   :  { %v208_v3 = vpop.f32.mrf.mxu0  ;;  %v321_v2 = vpop.f32.mrf.mxu1 }
  0xf1   :  { %4232 = vst [vmem:[#allocation29_spill] sm:$0xff] %v3133_v56  ;;  %4233 = vst [vmem:[#allocation30_spill] sm:$0xff] %v3136_v11  ;;  %v3138_v54 = vadd.f32 %v208_v3, %v115_v61  ;;  %v3141_v62 = vadd.f32 %v321_v2, %v3121_v60 }
  0xf3   :  { %4234 = vst [vmem:[#allocation31_spill] sm:$0xff] %v3138_v54  ;;  %4235 = vst [vmem:[#allocation32_spill] sm:$0xff] %v3141_v62 }
  0xf4   :  { %v212_v58 = vpop.f32.mrf.mxu0  ;;  %v325_v57 = vpop.f32.mrf.mxu1 }
  0xf5   :  { %v3143_v53 = vadd.f32 %v212_v58, %v111_v63  ;;  %v3146_v55 = vadd.f32 %v325_v57, %v3119_v4 }
  0xf6   :  { %v214_v52 = vpop.f32.mrf.mxu0  ;;  %v327_v29 = vpop.f32.mrf.mxu1 }
  0xf7   :  { %4236 = vst [vmem:[#allocation33_spill] sm:$0xff] %v3143_v53  ;;  %4237 = vst [vmem:[#allocation34_spill] sm:$0xff] %v3146_v55  ;;  %v3148_v56 = vadd.f32 %v214_v52, %v115_v61  ;;  %v3151_v47 = vadd.f32 %v327_v29, %v3121_v60 }
  0xf9   :  { %4238 = vst [vmem:[#allocation35_spill] sm:$0xff] %v3148_v56  ;;  %4239 = vst [vmem:[#allocation36_spill] sm:$0xff] %v3151_v47 }
  0xfa   :  { %v218_v11 = vpop.f32.mrf.mxu0  ;;  %v331_v3 = vpop.f32.mrf.mxu1 }
  0xfb   :  { %v3153_v54 = vadd.f32 %v218_v11, %v111_v63  ;;  %v3156_v2 = vadd.f32 %v331_v3, %v3119_v4 }
  0xfc   :  { %v220_v62 = vpop.f32.mrf.mxu0  ;;  %v333_v58 = vpop.f32.mrf.mxu1 }
  0xfd   :  { %4240 = vst [vmem:[#allocation37_spill] sm:$0xff] %v3153_v54  ;;  %4241 = vst [vmem:[#allocation38_spill] sm:$0xff] %v3156_v2  ;;  %v3158_v53 = vadd.f32 %v220_v62, %v115_v61  ;;  %v3161_v57 = vadd.f32 %v333_v58, %v3121_v60 }
  0xff   :  { %4242 = vst [vmem:[#allocation39_spill] sm:$0xff] %v3158_v53  ;;  %4243 = vst [vmem:[#allocation40_spill] sm:$0xff] %v3161_v57 }
 0x100   :  { %v224_v55 = vpop.f32.mrf.mxu0  ;;  %v337_v52 = vpop.f32.mrf.mxu1 }
 0x101   :  { %v3163_v56 = vadd.f32 %v224_v55, %v111_v63  ;;  %v3166_v29 = vadd.f32 %v337_v52, %v3119_v4 }
 0x102   :  { %v226_v47 = vpop.f32.mrf.mxu0  ;;  %v339_v11 = vpop.f32.mrf.mxu1 }
 0x103   :  { %4244 = vst [vmem:[#allocation41_spill] sm:$0xff] %v3163_v56  ;;  %4245 = vst [vmem:[#allocation42_spill] sm:$0xff] %v3166_v29  ;;  %v3168_v54 = vadd.f32 %v226_v47, %v115_v61  ;;  %v3171_v3 = vadd.f32 %v339_v11, %v3121_v60 }
 0x105   :  { %4246 = vst [vmem:[#allocation43_spill] sm:$0xff] %v3168_v54  ;;  %4247 = vst [vmem:[#allocation44_spill] sm:$0xff] %v3171_v3 }
 0x106   :  { %v230_v2 = vpop.f32.mrf.mxu0  ;;  %v343_v62 = vpop.f32.mrf.mxu1 }
 0x107   :  { %v3173_v53 = vadd.f32 %v230_v2, %v111_v63  ;;  %v3176_v58 = vadd.f32 %v343_v62, %v3119_v4 }
 0x108   :  { %v232_v57 = vpop.f32.mrf.mxu0  ;;  %v345_v55 = vpop.f32.mrf.mxu1 }
 0x109   :  { %4248 = vst [vmem:[#allocation45_spill] sm:$0xff] %v3173_v53  ;;  %4249 = vst [vmem:[#allocation46_spill] sm:$0xff] %v3176_v58  ;;  %v3178_v56 = vadd.f32 %v232_v57, %v115_v61  ;;  %v3181_v52 = vadd.f32 %v345_v55, %v3121_v60  ;;  %v195_v57 = vadd.f32 %v3108_v20, %v111_v63 }
 0x10a   :  { %v197_v55 = vadd.f32 %v3115_v0, %v115_v61 }
 0x10b   :  { %4250 = vst [vmem:[#allocation47_spill] sm:$0xff] %v3178_v56  ;;  %4251 = vst [vmem:[#allocation48_spill] sm:$0xff] %v3181_v52 }
 0x10c   :  { %v236_v29 = vpop.f32.mrf.mxu0  ;;  %v349_v47 = vpop.f32.mrf.mxu1 }
 0x10d   :  { %v3183_v54 = vadd.f32 %v236_v29, %v111_v63  ;;  %v3186_v11 = vadd.f32 %v349_v47, %v3119_v4  ;;  %v308_v47 = vadd.f32 %v3110_v38, %v3119_v4 }
 0x10e   :  { %v238_v3 = vpop.f32.mrf.mxu0  ;;  %v351_v2 = vpop.f32.mrf.mxu1 }
 0x10f   :  { %4252 = vst [vmem:[#allocation49_spill] sm:$0xff] %v3183_v54  ;;  %4253 = vst [vmem:[#allocation50_spill] sm:$0xff] %v3186_v11  ;;  %v3188_v53 = vadd.f32 %v238_v3, %v115_v61  ;;  %v3191_v62 = vadd.f32 %v351_v2, %v3121_v60  ;;  %v310_v2 = vadd.f32 %v3117_v1, %v3121_v60 }
 0x111   :  { %4254 = vst [vmem:[#allocation51_spill] sm:$0xff] %v3188_v53  ;;  %4255 = vst [vmem:[#allocation52_spill] sm:$0xff] %v3191_v62  ;;  %v3649_v62 = vld [vmem:[%s4128_s4 + $0x18] sm:$0xff] }
 0x112   :  { %v522_v58 = vpop.f32.mrf.mxu0  ;;  %v593_v54 = vpop.f32.mrf.mxu1 }
 0x113   :  { %v598_v52 = vadd.f32 %v522_v58, %v195_v57  ;;  %v600_v3 = vadd.f32 %v593_v54, %v308_v47 }
 0x114   :  { %v524_v56 = vpop.f32.mrf.mxu0  ;;  %v595_v53 = vpop.f32.mrf.mxu1 }
 0x115   :  { %v602_v59 = vmul.f32 0.5, %v598_v52  ;;  %v599_v29 = vadd.f32 %v524_v56, %v197_v55  ;;  %v601_v63 = vadd.f32 %v595_v53, %v310_v2 }
 0x117   :  { %2293 = vtanh.f32 %v602_v59  ;;  %v606_v11 = vmul.f32 0.5, %v599_v29  ;;  %v611_v20 = vmul.f32 0.5, %v601_v63  ;;  %v32_v59 = vld [vmem:[%s4131_s2] sm:$0xff] }
 0x119   :  { %2295 = vtanh.f32 %v606_v11 }
 0x11a   :  { %2297 = vtanh.f32 %v600_v3 }
 0x11b   :  { %2299 = vtanh.f32 %v611_v20 }
 0x124   :  { %v2294_v61 = vpop.eup %2293 }
 0x125   :  { %v604_v0 = vadd.f32 1.0, %v2294_v61 }
 0x126   :  { %v2296_v58 = vpop.eup %2295 }
 0x127   :  { %v605_v52 = vmul.f32 0.5, %v604_v0  ;;  %v608_v56 = vadd.f32 1.0, %v2296_v58  ;;  %v2298_v4 = vpop.eup %2297 }
 0x128   :  { %v2300_v53 = vpop.eup %2299 }
 0x129   :  { %v609_v38 = vmul.f32 0.5, %v608_v56  ;;  %v616_v11 = vmul.f32 %v2298_v4, %v605_v52  ;;  %v613_v60 = vadd.f32 1.0, %v2300_v53  ;;  %v3288_v56 = vld [vmem:[%s4128_s4 + $0x1e8] sm:$0xff]  ;;  %v3305_v4 = vld [vmem:[%s4128_s4 + $0x1f0] sm:$0xff] }
 0x12a   :  { %v3329_v53 = vld [vmem:[%s4128_s4 + $0x1d0] sm:$0xff] }
 0x12b   :  { %v615_v54 = vmul.f32 %v609_v38, %v32_v59  ;;  %v614_v1 = vmul.f32 0.5, %v613_v60  ;;  %v3293_v59 = vld [vmem:[%s4128_s4 + $0x1f8] sm:$0xff]  ;;  %v3300_v38 = vld [vmem:[%s4128_s4 + $0x1e0] sm:$0xff]  ;;  %v3336_v60 = vld [vmem:[%s4128_s4 + $0x1a8] sm:$0xff] }
 0x12d   :  { %v3202_v57 = vadd.f32 %v616_v11, %v615_v54  ;;  %v3312_v54 = vld [vmem:[%s4128_s4 + $0x1c8] sm:$0xff]  ;;  %v3317_v11 = vld [vmem:[%s4128_s4 + $0x1d8] sm:$0xff] }
 0x12f   :  { %2301 = vtanh.f32 %v3202_v57 }
 0x13c   :  { %v2302_v55 = vpop.eup %2301 }
 0x13d   :  { %v619_v29 = vmul.f32 %v2302_v55, %v614_v1  ;;  %v3341_v1 = vld [vmem:[%s4128_s4 + $0x1b8] sm:$0xff]  ;;  %v3348_v55 = vld [vmem:[%s4128_s4 + $0x1a0] sm:$0xff] }
 0x13f   :  { %620 = vst [vmem:[%s4132_s6] sm:$0xff] %v619_v29  ;;  %755 = vmatmul.mubr.f32.vlgmr.msra.gmra.mxu0 %v619_v29  ;;  %826 = vmatmul.mubr.f32.vlgmr.msra.gmra.mxu1 %v619_v29  ;;  %v3353_v29 = vld [vmem:[%s4128_s4 + $0x1b0] sm:$0xff] }
 0x140   :  { %926 = vmatpush1.msra.mxu0 %v2629_v5  ;;  %997 = vmatpush1.msra.mxu1 %v2634_v6  ;;  %v4256_v5 = vld [vmem:[#allocation5_spill] sm:$0xff]  ;;  %v4257_v6 = vld [vmem:[#allocation6_spill] sm:$0xff] }
 0x141   :  { %927 = vmatprep.subr.mxu0 %v2639_v7  ;;  %998 = vmatprep.subr.mxu1 %v2644_v8  ;;  %v4258_v7 = vld [vmem:[#allocation7_spill] sm:$0xff]  ;;  %v4259_v8 = vld [vmem:[#allocation8_spill] sm:$0xff]  ;;  %4281 = vst [vmem:[#allocation5_spill] sm:$0xff] %v3288_v56  ;;  %4282 = vst [vmem:[#allocation6_spill] sm:$0xff] %v3293_v59 }
 0x142   :  { %928 = vmatpush1.msra.mxu0 %v2653_v9  ;;  %999 = vmatpush1.msra.mxu1 %v2658_v10  ;;  %v4260_v9 = vld [vmem:[#allocation9_spill] sm:$0xff]  ;;  %v4261_v10 = vld [vmem:[#allocation10_spill] sm:$0xff] }
 0x143   :  { %929 = vmatprep.subr.mxu0 %v2670_v12  ;;  %1000 = vmatprep.subr.mxu1 %v2675_v13  ;;  %v4262_v12 = vld [vmem:[#allocation11_spill] sm:$0xff]  ;;  %v4263_v13 = vld [vmem:[#allocation12_spill] sm:$0xff] }
 0x144   :  { %930 = vmatpush1.msra.mxu0 %v2682_v14  ;;  %1001 = vmatpush1.msra.mxu1 %v2687_v15  ;;  %v4264_v14 = vld [vmem:[#allocation13_spill] sm:$0xff]  ;;  %v4265_v15 = vld [vmem:[#allocation14_spill] sm:$0xff] }
 0x145   :  { %931 = vmatprep.subr.mxu0 %v2692_v16  ;;  %1002 = vmatprep.subr.mxu1 %v2697_v17  ;;  %v4266_v16 = vld [vmem:[#allocation15_spill] sm:$0xff]  ;;  %v4267_v17 = vld [vmem:[#allocation16_spill] sm:$0xff] }
 0x146   :  { %932 = vmatpush1.msra.mxu0 %v2706_v18  ;;  %1003 = vmatpush1.msra.mxu1 %v2711_v19  ;;  %v4268_v18 = vld [vmem:[#allocation17_spill] sm:$0xff]  ;;  %v4269_v19 = vld [vmem:[#allocation18_spill] sm:$0xff] }
 0x147   :  { %933 = vmatprep.subr.mxu0 %v2723_v21  ;;  %1004 = vmatprep.subr.mxu1 %v2728_v22  ;;  %v4270_v21 = vld [vmem:[#allocation19_spill] sm:$0xff]  ;;  %v4271_v22 = vld [vmem:[#allocation20_spill] sm:$0xff] }
 0x148   :  { %934 = vmatpush1.msra.mxu0 %v2735_v23  ;;  %1005 = vmatpush1.msra.mxu1 %v2740_v24  ;;  %v4272_v23 = vld [vmem:[#allocation21_spill] sm:$0xff]  ;;  %v4273_v24 = vld [vmem:[#allocation22_spill] sm:$0xff] }
 0x149   :  { %935 = vmatprep.subr.mxu0 %v2745_v25  ;;  %1006 = vmatprep.subr.mxu1 %v2750_v26  ;;  %v4274_v25 = vld [vmem:[#allocation23_spill] sm:$0xff]  ;;  %v4275_v26 = vmov 0.0  }
 0x14a   :  { %936 = vmatpush1.msra.mxu0 %v2759_v27  ;;  %1007 = vmatpush1.msra.mxu1 %v2764_v28  ;;  %v4276_v27 = vld [vmem:[#allocation24_spill] sm:$0xff]  ;;  %4299 = vst [vmem:[#allocation23_spill] sm:$0xff] %v3649_v62 }
 0x14b   :  { %937 = vmatprep.subr.mxu0 %v2776_v30  ;;  %1008 = vmatprep.subr.mxu1 %v2781_v31  ;;  %v4277_v30 = vld [vmem:[#allocation25_spill] sm:$0xff] }
 0x14c   :  { %938 = vmatpush1.msra.mxu0 %v2788_v32  ;;  %1009 = vmatpush1.msra.mxu1 %v2793_v33 }
 0x14d   :  { %939 = vmatprep.subr.mxu0 %v2798_v34  ;;  %1010 = vmatprep.subr.mxu1 %v2803_v35  ;;  %v4278_v35 = vld [vmem:[#allocation27_spill] sm:$0xff] }
 0x14e   :  { %940 = vmatpush1.msra.mxu0 %v2812_v36  ;;  %1011 = vmatpush1.msra.mxu1 %v2817_v37  ;;  %v4279_v37 = vld [vmem:[#allocation26_spill] sm:$0xff] }
 0x14f   :  { %941 = vmatprep.subr.mxu0 %v2829_v39  ;;  %1012 = vmatprep.subr.mxu1 %v2834_v40 }
 0x150   :  { %942 = vmatpush1.msra.mxu0 %v2841_v41  ;;  %1013 = vmatpush1.msra.mxu1 %v2846_v42  ;;  %v4280_v42 = vld [vmem:[#allocation28_spill] sm:$0xff] }
 0x151   :  { %943 = vmatprep.subr.mxu0 %v2851_v43  ;;  %1014 = vmatprep.subr.mxu1 %v2856_v44 }
 0x152   :  { %944 = vmatpush1.msra.mxu0 %v2865_v45  ;;  %1015 = vmatpush1.msra.mxu1 %v2870_v46 }
 0x153   :  { %945 = vmatprep.subr.mxu0 %v2882_v48  ;;  %1016 = vmatprep.subr.mxu1 %v2887_v49 }
 0x154   :  { %946 = vmatpush1.msra.mxu0 %v2894_v50  ;;  %1017 = vmatpush1.msra.mxu1 %v2899_v51 }
 0x155   :  { %947 = vmatprep.subr.mxu0 %v4256_v5  ;;  %1018 = vmatprep.subr.mxu1 %v4257_v6  ;;  %v3360_v5 = vld [vmem:[%s4128_s4 + $0x188] sm:$0xff]  ;;  %v3365_v6 = vld [vmem:[%s4128_s4 + $0x198] sm:$0xff] }
 0x156   :  { %948 = vmatpush1.msra.mxu0 %v4258_v7  ;;  %1019 = vmatpush1.msra.mxu1 %v4259_v8  ;;  %v3372_v7 = vld [vmem:[%s4128_s4 + $0x180] sm:$0xff]  ;;  %v3377_v8 = vld [vmem:[%s4128_s4 + $0x190] sm:$0xff] }
 0x157   :  { %949 = vmatprep.subr.mxu0 %v4260_v9  ;;  %1020 = vmatprep.subr.mxu1 %v4261_v10  ;;  %v3384_v9 = vld [vmem:[%s4128_s4 + $0x168] sm:$0xff]  ;;  %v3389_v10 = vld [vmem:[%s4128_s4 + $0x178] sm:$0xff] }
 0x158   :  { %950 = vmatpush1.msra.mxu0 %v4262_v12  ;;  %1021 = vmatpush1.msra.mxu1 %v4263_v13  ;;  %v3396_v12 = vld [vmem:[%s4128_s4 + $0x160] sm:$0xff]  ;;  %v3401_v13 = vld [vmem:[%s4128_s4 + $0x170] sm:$0xff] }
 0x159   :  { %951 = vmatprep.subr.mxu0 %v4264_v14  ;;  %1022 = vmatprep.subr.mxu1 %v4265_v15  ;;  %v3408_v14 = vld [vmem:[%s4128_s4 + $0x148] sm:$0xff]  ;;  %v3413_v15 = vld [vmem:[%s4128_s4 + $0x158] sm:$0xff] }
 0x15a   :  { %952 = vmatpush1.msra.mxu0 %v4266_v16  ;;  %1023 = vmatpush1.msra.mxu1 %v4267_v17  ;;  %v3420_v16 = vld [vmem:[%s4128_s4 + $0x140] sm:$0xff]  ;;  %v3425_v17 = vld [vmem:[%s4128_s4 + $0x150] sm:$0xff] }
 0x15b   :  { %953 = vmatprep.subr.mxu0 %v4268_v18  ;;  %1024 = vmatprep.subr.mxu1 %v4269_v19  ;;  %v3432_v18 = vld [vmem:[%s4128_s4 + $0x128] sm:$0xff]  ;;  %v3437_v19 = vld [vmem:[%s4128_s4 + $0x138] sm:$0xff] }
 0x15c   :  { %954 = vmatpush1.msra.mxu0 %v4270_v21  ;;  %1025 = vmatpush1.msra.mxu1 %v4271_v22  ;;  %v3444_v21 = vld [vmem:[%s4128_s4 + $0x120] sm:$0xff]  ;;  %v3449_v22 = vld [vmem:[%s4128_s4 + $0x130] sm:$0xff] }
 0x15d   :  { %955 = vmatprep.subr.mxu0 %v4272_v23  ;;  %1026 = vmatprep.subr.mxu1 %v4273_v24  ;;  %v3456_v23 = vld [vmem:[%s4128_s4 + $0x108] sm:$0xff]  ;;  %v3461_v24 = vld [vmem:[%s4128_s4 + $0x118] sm:$0xff] }
 0x15e   :  { %956 = vmatpush1.msra.mxu0 %v4274_v25  ;;  %989 = vmatprep.mubr.f32.mxu0 %v4275_v26  ;;  %v3468_v25 = vld [vmem:[%s4128_s4 + $0x100] sm:$0xff] }
 0x15f   :  { %1027 = vmatpush1.msra.mxu1 %v4276_v27  ;;  %1060 = vmatprep.mubr.f32.mxu1 %v4275_v26  ;;  %v3473_v27 = vld [vmem:[%s4128_s4 + $0x110] sm:$0xff] }
 0x160   :  { %1160 = vmatprep.subr.mxu0 %v3288_v56  ;;  %1231 = vmatprep.subr.mxu1 %v3293_v59 }
 0x1ff   :  { %v756_v28 = vpop.f32.mrf.mxu0  ;;  %v827_v32 = vpop.f32.mrf.mxu1 }
 0x200   :  { %v832_v31 = vadd.f32 %v756_v28, %v4277_v30  ;;  %v834_v39 = vadd.f32 %v827_v32, %v4279_v37  ;;  %v3480_v28 = vld [vmem:[%s4128_s4 + $0xe8] sm:$0xff]  ;;  %v3485_v30 = vld [vmem:[%s4128_s4 + $0xf8] sm:$0xff]  ;;  %v3497_v32 = vld [vmem:[%s4128_s4 + $0xf0] sm:$0xff] }
 0x201   :  { %v758_v33 = vpop.f32.mrf.mxu0  ;;  %v829_v41 = vpop.f32.mrf.mxu1  ;;  %v3524_v37 = vld [vmem:[%s4128_s4 + $0xa8] sm:$0xff] }
 0x202   :  { %v836_v34 = vmul.f32 0.5, %v832_v31  ;;  %v833_v36 = vadd.f32 %v758_v33, %v4278_v35  ;;  %v835_v43 = vadd.f32 %v829_v41, %v4280_v42  ;;  %v3490_v31 = vld [vmem:[%s4128_s4 + $0xe0] sm:$0xff]  ;;  %v3502_v33 = vld [vmem:[%s4128_s4 + $0xc8] sm:$0xff]  ;;  %v3541_v41 = vld [vmem:[%s4128_s4 + $0xb0] sm:$0xff] }
 0x203   :  { %v3514_v35 = vld [vmem:[%s4128_s4 + $0xc0] sm:$0xff]  ;;  %v3548_v42 = vld [vmem:[%s4128_s4 + $0x88] sm:$0xff] }
 0x204   :  { %2303 = vtanh.f32 %v836_v34  ;;  %v840_v40 = vmul.f32 0.5, %v833_v36  ;;  %v845_v44 = vmul.f32 0.5, %v835_v43  ;;  %v3507_v34 = vld [vmem:[%s4128_s4 + $0xd8] sm:$0xff]  ;;  %v3519_v36 = vld [vmem:[%s4128_s4 + $0xd0] sm:$0xff] }
 0x205   :  { %v3553_v43 = vld [vmem:[%s4128_s4 + $0x98] sm:$0xff] }
 0x206   :  { %2305 = vtanh.f32 %v840_v40  ;;  %v3536_v40 = vld [vmem:[%s4128_s4 + $0xa0] sm:$0xff]  ;;  %4283 = vst [vmem:[#allocation7_spill] sm:$0xff] %v3553_v43 }
 0x207   :  { %2307 = vtanh.f32 %v834_v39  ;;  %v3531_v39 = vld [vmem:[%s4128_s4 + $0xb8] sm:$0xff] }
 0x208   :  { %2309 = vtanh.f32 %v845_v44  ;;  %v3560_v44 = vld [vmem:[%s4128_s4 + $0x80] sm:$0xff] }
 0x209   :  { %4284 = vst [vmem:[#allocation8_spill] sm:$0xff] %v3560_v44 }
 0x211   :  { %v2304_v45 = vpop.eup %2303 }
 0x212   :  { %v838_v46 = vadd.f32 1.0, %v2304_v45  ;;  %v3565_v45 = vld [vmem:[%s4128_s4 + $0x90] sm:$0xff] }
 0x213   :  { %v2306_v48 = vpop.eup %2305  ;;  %4285 = vst [vmem:[#allocation9_spill] sm:$0xff] %v3565_v45 }
 0x214   :  { %v839_v49 = vmul.f32 0.5, %v838_v46  ;;  %v842_v50 = vadd.f32 1.0, %v2306_v48  ;;  %v2308_v51 = vpop.eup %2307  ;;  %v3572_v46 = vld [vmem:[%s4128_s4 + $0x68] sm:$0xff]  ;;  %v3577_v48 = vld [vmem:[%s4128_s4 + $0x78] sm:$0xff] }
 0x215   :  { %v2310_v20 = vpop.eup %2309  ;;  %4286 = vst [vmem:[#allocation10_spill] sm:$0xff] %v3572_v46  ;;  %4287 = vst [vmem:[#allocation11_spill] sm:$0xff] %v3577_v48 }
 0x216   :  { %v843_v47 = vmul.f32 0.5, %v842_v50  ;;  %v850_v3 = vmul.f32 %v2308_v51, %v839_v49  ;;  %v847_v61 = vadd.f32 1.0, %v2310_v20  ;;  %v3584_v49 = vld [vmem:[%s4128_s4 + $0x60] sm:$0xff]  ;;  %v3589_v50 = vld [vmem:[%s4128_s4 + $0x70] sm:$0xff]  ;;  %v3596_v51 = vld [vmem:[%s4128_s4 + $0x48] sm:$0xff] }
 0x217   :  { %4288 = vst [vmem:[#allocation12_spill] sm:$0xff] %v3584_v49  ;;  %4289 = vst [vmem:[#allocation13_spill] sm:$0xff] %v3589_v50  ;;  %v3620_v20 = vld [vmem:[%s4128_s4 + $0x28] sm:$0xff] }
 0x218   :  { %v849_v2 = vmul.f32 %v843_v47, %v3202_v57  ;;  %v848_v0 = vmul.f32 0.5, %v847_v61  ;;  %v3324_v57 = vld [vmem:[%s4128_s4 + $0x1c0] sm:$0xff]  ;;  %4290 = vst [vmem:[#allocation14_spill] sm:$0xff] %v3596_v51  ;;  %v3601_v47 = vld [vmem:[%s4128_s4 + $0x58] sm:$0xff]  ;;  %4294 = vst [vmem:[#allocation18_spill] sm:$0xff] %v3620_v20 }
 0x219   :  { %4291 = vst [vmem:[#allocation15_spill] sm:$0xff] %v3601_v47  ;;  %v3625_v61 = vld [vmem:[%s4128_s4 + $0x38] sm:$0xff] }
 0x21a   :  { %v3277_v63 = vadd.f32 %v850_v3, %v849_v2  ;;  %v3608_v3 = vld [vmem:[%s4128_s4 + $0x40] sm:$0xff]  ;;  %v3613_v2 = vld [vmem:[%s4128_s4 + $0x50] sm:$0xff]  ;;  %4295 = vst [vmem:[#allocation19_spill] sm:$0xff] %v3625_v61 }
 0x21b   :  { %4292 = vst [vmem:[#allocation16_spill] sm:$0xff] %v3608_v3  ;;  %4293 = vst [vmem:[#allocation17_spill] sm:$0xff] %v3613_v2 }
 0x21c   :  { %2311 = vtanh.f32 %v3277_v63 }
 0x229   :  { %v2312_v58 = vpop.eup %2311 }
 0x22a   :  { %v853_v52 = vmul.f32 %v2312_v58, %v848_v0  ;;  %v3632_v0 = vld [vmem:[%s4128_s4 + $0x20] sm:$0xff]  ;;  %v3637_v58 = vld [vmem:[%s4128_s4 + $0x30] sm:$0xff] }
 0x22b   :  { %4296 = vst [vmem:[#allocation20_spill] sm:$0xff] %v3632_v0  ;;  %4297 = vst [vmem:[#allocation21_spill] sm:$0xff] %v3637_v58 }
 0x22c   :  { %2285 = vst [vmem:[%s4132_s6 + $0x8] sm:$0xff] %v853_v52  ;;  %990 = vmatmul.mubr.f32.vlgmr.msra.gmra.mxu0 %v853_v52  ;;  %1061 = vmatmul.mubr.f32.vlgmr.msra.gmra.mxu1 %v853_v52  ;;  %v3644_v52 = vld [vmem:[%s4128_s4 + $0x8] sm:$0xff] }
 0x22d   :  { %1224 = vmatprep.mubr.f32.mxu0 %v4275_v26  ;;  %1295 = vmatprep.mubr.f32.mxu1 %v4275_v26  ;;  %4298 = vst [vmem:[#allocation22_spill] sm:$0xff] %v3644_v52  ;;  %v3656_v26 = vld [vmem:[%s4128_s4] sm:$0xff] }
 0x22e   :  { %1161 = vmatpush1.msra.mxu0 %v3300_v38  ;;  %1232 = vmatpush1.msra.mxu1 %v3305_v4  ;;  %4300 = vst [vmem:[#allocation24_spill] sm:$0xff] %v3656_v26 }
 0x22f   :  { %1162 = vmatprep.subr.mxu0 %v3312_v54  ;;  %1233 = vmatprep.subr.mxu1 %v3317_v11 }
 0x230   :  { %1163 = vmatpush1.msra.mxu0 %v3324_v57  ;;  %1234 = vmatpush1.msra.mxu1 %v3329_v53 }
 0x231   :  { %1164 = vmatprep.subr.mxu0 %v3336_v60  ;;  %1235 = vmatprep.subr.mxu1 %v3341_v1 }
 0x232   :  { %1165 = vmatpush1.msra.mxu0 %v3348_v55  ;;  %1236 = vmatpush1.msra.mxu1 %v3353_v29 }
 0x233   :  { %1166 = vmatprep.subr.mxu0 %v3360_v5  ;;  %1237 = vmatprep.subr.mxu1 %v3365_v6 }
 0x234   :  { %1167 = vmatpush1.msra.mxu0 %v3372_v7  ;;  %1238 = vmatpush1.msra.mxu1 %v3377_v8 }
 0x235   :  { %1168 = vmatprep.subr.mxu0 %v3384_v9  ;;  %1239 = vmatprep.subr.mxu1 %v3389_v10 }
 0x236   :  { %1169 = vmatpush1.msra.mxu0 %v3396_v12  ;;  %1240 = vmatpush1.msra.mxu1 %v3401_v13 }
 0x237   :  { %1170 = vmatprep.subr.mxu0 %v3408_v14  ;;  %1241 = vmatprep.subr.mxu1 %v3413_v15 }
 0x238   :  { %1171 = vmatpush1.msra.mxu0 %v3420_v16  ;;  %1242 = vmatpush1.msra.mxu1 %v3425_v17 }
 0x239   :  { %1172 = vmatprep.subr.mxu0 %v3432_v18  ;;  %1243 = vmatprep.subr.mxu1 %v3437_v19 }
 0x23a   :  { %1173 = vmatpush1.msra.mxu0 %v3444_v21  ;;  %1244 = vmatpush1.msra.mxu1 %v3449_v22 }
 0x23b   :  { %1174 = vmatprep.subr.mxu0 %v3456_v23  ;;  %1245 = vmatprep.subr.mxu1 %v3461_v24 }
 0x23c   :  { %1175 = vmatpush1.msra.mxu0 %v3468_v25  ;;  %1246 = vmatpush1.msra.mxu1 %v3473_v27 }
 0x23d   :  { %1176 = vmatprep.subr.mxu0 %v3480_v28  ;;  %1247 = vmatprep.subr.mxu1 %v3485_v30 }
 0x23e   :  { %1177 = vmatpush1.msra.mxu0 %v3490_v31  ;;  %1248 = vmatpush1.msra.mxu1 %v3497_v32 }
 0x23f   :  { %1178 = vmatprep.subr.mxu0 %v3502_v33  ;;  %1249 = vmatprep.subr.mxu1 %v3507_v34 }
 0x240   :  { %1179 = vmatpush1.msra.mxu0 %v3514_v35  ;;  %1250 = vmatpush1.msra.mxu1 %v3519_v36 }
 0x241   :  { %1180 = vmatprep.subr.mxu0 %v3524_v37  ;;  %1251 = vmatprep.subr.mxu1 %v3531_v39 }
 0x242   :  { %1181 = vmatpush1.msra.mxu0 %v3536_v40  ;;  %1252 = vmatpush1.msra.mxu1 %v3541_v41 }
 0x243   :  { %1182 = vmatprep.subr.mxu0 %v3548_v42  ;;  %1253 = vmatprep.subr.mxu1 %v3553_v43 }
 0x244   :  { %1183 = vmatpush1.msra.mxu0 %v3560_v44  ;;  %1254 = vmatpush1.msra.mxu1 %v3565_v45 }
 0x245   :  { %1184 = vmatprep.subr.mxu0 %v3572_v46  ;;  %1255 = vmatprep.subr.mxu1 %v3577_v48 }
 0x246   :  { %1185 = vmatpush1.msra.mxu0 %v3584_v49  ;;  %1256 = vmatpush1.msra.mxu1 %v3589_v50  ;;  %v4303_v50 = vld [vmem:[#allocation31_spill] sm:$0xff] }
 0x247   :  { %1186 = vmatprep.subr.mxu0 %v3596_v51  ;;  %1257 = vmatprep.subr.mxu1 %v3601_v47 }
 0x248   :  { %1187 = vmatpush1.msra.mxu0 %v3608_v3  ;;  %1258 = vmatpush1.msra.mxu1 %v3613_v2  ;;  %v3661_v2 = vld [vmem:[%s4128_s4 + $0x10] sm:$0xff] }
 0x249   :  { %1188 = vmatprep.subr.mxu0 %v3620_v20  ;;  %1259 = vmatprep.subr.mxu1 %v3625_v61  ;;  %4301 = vst [vmem:[#allocation25_spill] sm:$0xff] %v3661_v2  ;;  %v4302_v20 = vld [vmem:[#allocation29_spill] sm:$0xff] }
 0x24a   :  { %1189 = vmatpush1.msra.mxu0 %v3632_v0  ;;  %1260 = vmatpush1.msra.mxu1 %v3637_v58 }
 0x24b   :  { %1190 = vmatprep.subr.mxu0 %v3644_v52  ;;  %1261 = vmatprep.subr.mxu1 %v3649_v62  ;;  %v4304_v52 = vld [vmem:[#allocation30_spill] sm:$0xff] }
 0x24c   :  { %1191 = vmatpush1.msra.mxu0 %v3656_v26  ;;  %1262 = vmatpush1.msra.mxu1 %v3661_v2  ;;  %v4305_v2 = vld [vmem:[#allocation32_spill] sm:$0xff] }
 0x24d   :  { %1395 = vmatprep.subr.mxu0 %v3288_v56  ;;  %1466 = vmatprep.subr.mxu1 %v3293_v59 }
 0x2ec   :  { %v991_v61 = vpop.f32.mrf.mxu0  ;;  %v1062_v47 = vpop.f32.mrf.mxu1 }
 0x2ed   :  { %v1067_v3 = vadd.f32 %v991_v61, %v4302_v20  ;;  %v1069_v49 = vadd.f32 %v1062_v47, %v4304_v52  ;;  %v4316_v52 = vld [vmem:[#allocation17_spill] sm:$0xff] }
 0x2ee   :  { %v993_v51 = vpop.f32.mrf.mxu0  ;;  %v1064_v26 = vpop.f32.mrf.mxu1 }
 0x2ef   :  { %v1071_v0 = vmul.f32 0.5, %v1067_v3  ;;  %v1068_v58 = vadd.f32 %v993_v51, %v4303_v50  ;;  %v1070_v48 = vadd.f32 %v1064_v26, %v4305_v2  ;;  %v4313_v2 = vld [vmem:[#allocation14_spill] sm:$0xff] }
 0x2f1   :  { %2313 = vtanh.f32 %v1071_v0  ;;  %v1075_v62 = vmul.f32 0.5, %v1068_v58  ;;  %v1080_v56 = vmul.f32 0.5, %v1070_v48  ;;  %v4314_v0 = vld [vmem:[#allocation15_spill] sm:$0xff]  ;;  %v4315_v58 = vld [vmem:[#allocation16_spill] sm:$0xff] }
 0x2f3   :  { %2315 = vtanh.f32 %v1075_v62 }
 0x2f4   :  { %2317 = vtanh.f32 %v1069_v49 }
 0x2f5   :  { %2319 = vtanh.f32 %v1080_v56  ;;  %v4307_v56 = vld [vmem:[#allocation8_spill] sm:$0xff] }
 0x2fe   :  { %v2314_v46 = vpop.eup %2313 }
 0x2ff   :  { %v1073_v59 = vadd.f32 1.0, %v2314_v46  ;;  %v4312_v46 = vld [vmem:[#allocation13_spill] sm:$0xff] }
 0x300   :  { %v2316_v45 = vpop.eup %2315 }
 0x301   :  { %v1074_v44 = vmul.f32 0.5, %v1073_v59  ;;  %v1077_v20 = vadd.f32 1.0, %v2316_v45  ;;  %v2318_v61 = vpop.eup %2317  ;;  %v4308_v59 = vld [vmem:[#allocation9_spill] sm:$0xff]  ;;  %v4311_v45 = vld [vmem:[#allocation12_spill] sm:$0xff] }
 0x302   :  { %v2320_v62 = vpop.eup %2319 }
 0x303   :  { %v1078_v3 = vmul.f32 0.5, %v1077_v20  ;;  %v1085_v43 = vmul.f32 %v2318_v61, %v1074_v44  ;;  %v1082_v49 = vadd.f32 1.0, %v2320_v62  ;;  %v4310_v44 = vld [vmem:[#allocation11_spill] sm:$0xff]  ;;  %v4317_v20 = vld [vmem:[#allocation18_spill] sm:$0xff] }
 0x304   :  { %v4318_v61 = vld [vmem:[#allocation19_spill] sm:$0xff]  ;;  %v4321_v62 = vld [vmem:[#allocation22_spill] sm:$0xff] }
 0x305   :  { %v1084_v50 = vmul.f32 %v1078_v3, %v3277_v63  ;;  %v1083_v47 = vmul.f32 0.5, %v1082_v49  ;;  %v4306_v63 = vld [vmem:[#allocation7_spill] sm:$0xff]  ;;  %v4319_v3 = vld [vmem:[#allocation20_spill] sm:$0xff] }
 0x306   :  { %v4322_v49 = vld [vmem:[#allocation23_spill] sm:$0xff] }
 0x307   :  { %v3676_v51 = vadd.f32 %v1085_v43, %v1084_v50  ;;  %v4309_v43 = vld [vmem:[#allocation10_spill] sm:$0xff]  ;;  %v4320_v50 = vld [vmem:[#allocation21_spill] sm:$0xff] }
 0x309   :  { %2321 = vtanh.f32 %v3676_v51 }
 0x316   :  { %v2322_v26 = vpop.eup %2321 }
 0x317   :  { %v1088_v48 = vmul.f32 %v2322_v26, %v1083_v47  ;;  %v4323_v47 = vld [vmem:[#allocation24_spill] sm:$0xff]  ;;  %v4324_v26 = vmov 0.0  }
 0x319   :  { %2286 = vst [vmem:[%s4132_s6 + $0x10] sm:$0xff] %v1088_v48  ;;  %1225 = vmatmul.mubr.f32.vlgmr.msra.gmra.mxu0 %v1088_v48  ;;  %1296 = vmatmul.mubr.f32.vlgmr.msra.gmra.mxu1 %v1088_v48  ;;  %v4325_v48 = vld [vmem:[#allocation25_spill] sm:$0xff] }
 0x31a   :  { %1396 = vmatpush1.msra.mxu0 %v3300_v38  ;;  %1467 = vmatpush1.msra.mxu1 %v3305_v4 }
 0x31b   :  { %1397 = vmatprep.subr.mxu0 %v3312_v54  ;;  %1468 = vmatprep.subr.mxu1 %v3317_v11 }
 0x31c   :  { %1398 = vmatpush1.msra.mxu0 %v3324_v57  ;;  %1469 = vmatpush1.msra.mxu1 %v3329_v53 }
 0x31d   :  { %1399 = vmatprep.subr.mxu0 %v3336_v60  ;;  %1470 = vmatprep.subr.mxu1 %v3341_v1 }
 0x31e   :  { %1400 = vmatpush1.msra.mxu0 %v3348_v55  ;;  %1471 = vmatpush1.msra.mxu1 %v3353_v29 }
 0x31f   :  { %1401 = vmatprep.subr.mxu0 %v3360_v5  ;;  %1472 = vmatprep.subr.mxu1 %v3365_v6 }
 0x320   :  { %1402 = vmatpush1.msra.mxu0 %v3372_v7  ;;  %1473 = vmatpush1.msra.mxu1 %v3377_v8 }
 0x321   :  { %1403 = vmatprep.subr.mxu0 %v3384_v9  ;;  %1474 = vmatprep.subr.mxu1 %v3389_v10 }
 0x322   :  { %1404 = vmatpush1.msra.mxu0 %v3396_v12  ;;  %1475 = vmatpush1.msra.mxu1 %v3401_v13 }
 0x323   :  { %1405 = vmatprep.subr.mxu0 %v3408_v14  ;;  %1476 = vmatprep.subr.mxu1 %v3413_v15 }
 0x324   :  { %1406 = vmatpush1.msra.mxu0 %v3420_v16  ;;  %1477 = vmatpush1.msra.mxu1 %v3425_v17 }
 0x325   :  { %1407 = vmatprep.subr.mxu0 %v3432_v18  ;;  %1478 = vmatprep.subr.mxu1 %v3437_v19 }
 0x326   :  { %1408 = vmatpush1.msra.mxu0 %v3444_v21  ;;  %1479 = vmatpush1.msra.mxu1 %v3449_v22 }
 0x327   :  { %1409 = vmatprep.subr.mxu0 %v3456_v23  ;;  %1480 = vmatprep.subr.mxu1 %v3461_v24 }
 0x328   :  { %1410 = vmatpush1.msra.mxu0 %v3468_v25  ;;  %1481 = vmatpush1.msra.mxu1 %v3473_v27 }
 0x329   :  { %1411 = vmatprep.subr.mxu0 %v3480_v28  ;;  %1482 = vmatprep.subr.mxu1 %v3485_v30 }
 0x32a   :  { %1412 = vmatpush1.msra.mxu0 %v3490_v31  ;;  %1483 = vmatpush1.msra.mxu1 %v3497_v32 }
 0x32b   :  { %1413 = vmatprep.subr.mxu0 %v3502_v33  ;;  %1484 = vmatprep.subr.mxu1 %v3507_v34 }
 0x32c   :  { %1414 = vmatpush1.msra.mxu0 %v3514_v35  ;;  %1485 = vmatpush1.msra.mxu1 %v3519_v36 }
 0x32d   :  { %1415 = vmatprep.subr.mxu0 %v3524_v37  ;;  %1486 = vmatprep.subr.mxu1 %v3531_v39 }
 0x32e   :  { %1416 = vmatpush1.msra.mxu0 %v3536_v40  ;;  %1487 = vmatpush1.msra.mxu1 %v3541_v41 }
 0x32f   :  { %1417 = vmatprep.subr.mxu0 %v3548_v42  ;;  %1488 = vmatprep.subr.mxu1 %v4306_v63 }
 0x330   :  { %1418 = vmatpush1.msra.mxu0 %v4307_v56  ;;  %1489 = vmatpush1.msra.mxu1 %v4308_v59 }
 0x331   :  { %1419 = vmatprep.subr.mxu0 %v4309_v43  ;;  %1490 = vmatprep.subr.mxu1 %v4310_v44 }
 0x332   :  { %1420 = vmatpush1.msra.mxu0 %v4311_v45  ;;  %1491 = vmatpush1.msra.mxu1 %v4312_v46 }
 0x333   :  { %1421 = vmatprep.subr.mxu0 %v4313_v2  ;;  %1492 = vmatprep.subr.mxu1 %v4314_v0  ;;  %v4329_v2 = vld [vmem:[#allocation35_spill] sm:$0xff] }
 0x334   :  { %1422 = vmatpush1.msra.mxu0 %v4315_v58  ;;  %1493 = vmatpush1.msra.mxu1 %v4316_v52  ;;  %v4326_v52 = vld [vmem:[#allocation5_spill] sm:$0xff] }
 0x335   :  { %1423 = vmatprep.subr.mxu0 %v4317_v20  ;;  %1494 = vmatprep.subr.mxu1 %v4318_v61  ;;  %v4327_v20 = vld [vmem:[#allocation6_spill] sm:$0xff] }
 0x336   :  { %1424 = vmatpush1.msra.mxu0 %v4319_v3  ;;  %1495 = vmatpush1.msra.mxu1 %v4320_v50  ;;  %v4328_v3 = vld [vmem:[#allocation33_spill] sm:$0xff] }
 0x337   :  { %1425 = vmatprep.subr.mxu0 %v4321_v62  ;;  %1496 = vmatprep.subr.mxu1 %v4322_v49 }
 0x338   :  { %1426 = vmatpush1.msra.mxu0 %v4323_v47  ;;  %1459 = vmatprep.mubr.f32.mxu0 %v4324_v26  ;;  %v4330_v47 = vld [vmem:[#allocation34_spill] sm:$0xff] }
 0x339   :  { %1497 = vmatpush1.msra.mxu1 %v4325_v48  ;;  %1530 = vmatprep.mubr.f32.mxu1 %v4324_v26  ;;  %v4331_v26 = vld [vmem:[#allocation36_spill] sm:$0xff] }
 0x33a   :  { %1630 = vmatprep.subr.mxu0 %v4326_v52  ;;  %1701 = vmatprep.subr.mxu1 %v4327_v20 }
 0x3d9   :  { %v1226_v61 = vpop.f32.mrf.mxu0  ;;  %v1297_v50 = vpop.f32.mrf.mxu1 }
 0x3da   :  { %v1302_v58 = vadd.f32 %v1226_v61, %v4328_v3  ;;  %v1304_v46 = vadd.f32 %v1297_v50, %v4330_v47  ;;  %v4340_v47 = vld [vmem:[#allocation15_spill] sm:$0xff] }
 0x3db   :  { %v1228_v0 = vpop.f32.mrf.mxu0  ;;  %v1299_v48 = vpop.f32.mrf.mxu1 }
 0x3dc   :  { %v1306_v62 = vmul.f32 0.5, %v1302_v58  ;;  %v1303_v49 = vadd.f32 %v1228_v0, %v4329_v2  ;;  %v1305_v44 = vadd.f32 %v1299_v48, %v4331_v26  ;;  %v4341_v26 = vld [vmem:[#allocation16_spill] sm:$0xff]  ;;  %v4342_v48 = vld [vmem:[#allocation17_spill] sm:$0xff] }
 0x3de   :  { %2323 = vtanh.f32 %v1306_v62  ;;  %v1310_v45 = vmul.f32 0.5, %v1303_v49  ;;  %v1315_v52 = vmul.f32 0.5, %v1305_v44  ;;  %v4339_v49 = vld [vmem:[#allocation14_spill] sm:$0xff] }
 0x3e0   :  { %2325 = vtanh.f32 %v1310_v45 }
 0x3e1   :  { %2327 = vtanh.f32 %v1304_v46 }
 0x3e2   :  { %2329 = vtanh.f32 %v1315_v52  ;;  %v4337_v52 = vld [vmem:[#allocation12_spill] sm:$0xff] }
 0x3eb   :  { %v2324_v43 = vpop.eup %2323 }
 0x3ec   :  { %v1308_v20 = vadd.f32 1.0, %v2324_v43  ;;  %v4336_v43 = vld [vmem:[#allocation11_spill] sm:$0xff] }
 0x3ed   :  { %v2326_v59 = vpop.eup %2325 }
 0x3ee   :  { %v1309_v56 = vmul.f32 0.5, %v1308_v20  ;;  %v1312_v61 = vadd.f32 1.0, %v2326_v59  ;;  %v2328_v3 = vpop.eup %2327  ;;  %v4335_v59 = vld [vmem:[#allocation10_spill] sm:$0xff]  ;;  %v4338_v20 = vld [vmem:[#allocation13_spill] sm:$0xff] }
 0x3ef   :  { %v2330_v45 = vpop.eup %2329 }
 0x3f0   :  { %v1313_v58 = vmul.f32 0.5, %v1312_v61  ;;  %v1320_v63 = vmul.f32 %v2328_v3, %v1309_v56  ;;  %v1317_v46 = vadd.f32 1.0, %v2330_v45  ;;  %v4334_v56 = vld [vmem:[#allocation9_spill] sm:$0xff]  ;;  %v4343_v61 = vld [vmem:[#allocation18_spill] sm:$0xff]  ;;  %v4344_v3 = vld [vmem:[#allocation19_spill] sm:$0xff] }
 0x3f1   :  { %v4347_v45 = vld [vmem:[#allocation22_spill] sm:$0xff] }
 0x3f2   :  { %v1319_v2 = vmul.f32 %v1313_v58, %v3676_v51  ;;  %v1318_v50 = vmul.f32 0.5, %v1317_v46  ;;  %v4332_v51 = vld [vmem:[#allocation7_spill] sm:$0xff]  ;;  %v4345_v58 = vld [vmem:[#allocation20_spill] sm:$0xff] }
 0x3f3   :  { %v4348_v46 = vld [vmem:[#allocation23_spill] sm:$0xff] }
 0x3f4   :  { %v3753_v0 = vadd.f32 %v1320_v63, %v1319_v2  ;;  %v4333_v63 = vld [vmem:[#allocation8_spill] sm:$0xff]  ;;  %v4346_v2 = vld [vmem:[#allocation21_spill] sm:$0xff] }
 0x3f6   :  { %2331 = vtanh.f32 %v3753_v0 }
 0x403   :  { %v2332_v62 = vpop.eup %2331 }
 0x404   :  { %v1323_v44 = vmul.f32 %v2332_v62, %v1318_v50  ;;  %v4349_v50 = vld [vmem:[#allocation24_spill] sm:$0xff]  ;;  %v4350_v62 = vmov 0.0  }
 0x406   :  { %2287 = vst [vmem:[%s4132_s6 + $0x18] sm:$0xff] %v1323_v44  ;;  %1460 = vmatmul.mubr.f32.vlgmr.msra.gmra.mxu0 %v1323_v44  ;;  %1531 = vmatmul.mubr.f32.vlgmr.msra.gmra.mxu1 %v1323_v44  ;;  %v4351_v44 = vld [vmem:[#allocation25_spill] sm:$0xff] }
 0x407   :  { %1631 = vmatpush1.msra.mxu0 %v3300_v38  ;;  %1702 = vmatpush1.msra.mxu1 %v3305_v4 }
 0x408   :  { %1632 = vmatprep.subr.mxu0 %v3312_v54  ;;  %1703 = vmatprep.subr.mxu1 %v3317_v11 }
 0x409   :  { %1633 = vmatpush1.msra.mxu0 %v3324_v57  ;;  %1704 = vmatpush1.msra.mxu1 %v3329_v53 }
 0x40a   :  { %1634 = vmatprep.subr.mxu0 %v3336_v60  ;;  %1705 = vmatprep.subr.mxu1 %v3341_v1 }
 0x40b   :  { %1635 = vmatpush1.msra.mxu0 %v3348_v55  ;;  %1706 = vmatpush1.msra.mxu1 %v3353_v29 }
 0x40c   :  { %1636 = vmatprep.subr.mxu0 %v3360_v5  ;;  %1707 = vmatprep.subr.mxu1 %v3365_v6 }
 0x40d   :  { %1637 = vmatpush1.msra.mxu0 %v3372_v7  ;;  %1708 = vmatpush1.msra.mxu1 %v3377_v8 }
 0x40e   :  { %1638 = vmatprep.subr.mxu0 %v3384_v9  ;;  %1709 = vmatprep.subr.mxu1 %v3389_v10 }
 0x40f   :  { %1639 = vmatpush1.msra.mxu0 %v3396_v12  ;;  %1710 = vmatpush1.msra.mxu1 %v3401_v13 }
 0x410   :  { %1640 = vmatprep.subr.mxu0 %v3408_v14  ;;  %1711 = vmatprep.subr.mxu1 %v3413_v15 }
 0x411   :  { %1641 = vmatpush1.msra.mxu0 %v3420_v16  ;;  %1712 = vmatpush1.msra.mxu1 %v3425_v17 }
 0x412   :  { %1642 = vmatprep.subr.mxu0 %v3432_v18  ;;  %1713 = vmatprep.subr.mxu1 %v3437_v19 }
 0x413   :  { %1643 = vmatpush1.msra.mxu0 %v3444_v21  ;;  %1714 = vmatpush1.msra.mxu1 %v3449_v22 }
 0x414   :  { %1644 = vmatprep.subr.mxu0 %v3456_v23  ;;  %1715 = vmatprep.subr.mxu1 %v3461_v24 }
 0x415   :  { %1645 = vmatpush1.msra.mxu0 %v3468_v25  ;;  %1716 = vmatpush1.msra.mxu1 %v3473_v27 }
 0x416   :  { %1646 = vmatprep.subr.mxu0 %v3480_v28  ;;  %1717 = vmatprep.subr.mxu1 %v3485_v30 }
 0x417   :  { %1647 = vmatpush1.msra.mxu0 %v3490_v31  ;;  %1718 = vmatpush1.msra.mxu1 %v3497_v32 }
 0x418   :  { %1648 = vmatprep.subr.mxu0 %v3502_v33  ;;  %1719 = vmatprep.subr.mxu1 %v3507_v34 }
 0x419   :  { %1649 = vmatpush1.msra.mxu0 %v3514_v35  ;;  %1720 = vmatpush1.msra.mxu1 %v3519_v36 }
 0x41a   :  { %1650 = vmatprep.subr.mxu0 %v3524_v37  ;;  %1721 = vmatprep.subr.mxu1 %v3531_v39 }
 0x41b   :  { %1651 = vmatpush1.msra.mxu0 %v3536_v40  ;;  %1722 = vmatpush1.msra.mxu1 %v3541_v41 }
 0x41c   :  { %1652 = vmatprep.subr.mxu0 %v3548_v42  ;;  %1723 = vmatprep.subr.mxu1 %v4332_v51 }
 0x41d   :  { %1653 = vmatpush1.msra.mxu0 %v4333_v63  ;;  %1724 = vmatpush1.msra.mxu1 %v4334_v56 }
 0x41e   :  { %1654 = vmatprep.subr.mxu0 %v4335_v59  ;;  %1725 = vmatprep.subr.mxu1 %v4336_v43 }
 0x41f   :  { %1655 = vmatpush1.msra.mxu0 %v4337_v52  ;;  %1726 = vmatpush1.msra.mxu1 %v4338_v20 }
 0x420   :  { %1656 = vmatprep.subr.mxu0 %v4339_v49  ;;  %1727 = vmatprep.subr.mxu1 %v4340_v47  ;;  %v4355_v49 = vld [vmem:[#allocation39_spill] sm:$0xff] }
 0x421   :  { %1657 = vmatpush1.msra.mxu0 %v4341_v26  ;;  %1728 = vmatpush1.msra.mxu1 %v4342_v48  ;;  %v4352_v48 = vld [vmem:[#allocation5_spill] sm:$0xff] }
 0x422   :  { %1658 = vmatprep.subr.mxu0 %v4343_v61  ;;  %1729 = vmatprep.subr.mxu1 %v4344_v3  ;;  %v4353_v61 = vld [vmem:[#allocation6_spill] sm:$0xff] }
 0x423   :  { %1659 = vmatpush1.msra.mxu0 %v4345_v58  ;;  %1730 = vmatpush1.msra.mxu1 %v4346_v2  ;;  %v4354_v58 = vld [vmem:[#allocation37_spill] sm:$0xff] }
 0x424   :  { %1660 = vmatprep.subr.mxu0 %v4347_v45  ;;  %1731 = vmatprep.subr.mxu1 %v4348_v46 }
 0x425   :  { %1661 = vmatpush1.msra.mxu0 %v4349_v50  ;;  %1694 = vmatprep.mubr.f32.mxu0 %v4350_v62  ;;  %v4356_v50 = vld [vmem:[#allocation38_spill] sm:$0xff] }
 0x426   :  { %1732 = vmatpush1.msra.mxu1 %v4351_v44  ;;  %1765 = vmatprep.mubr.f32.mxu1 %v4350_v62  ;;  %v4357_v62 = vld [vmem:[#allocation40_spill] sm:$0xff] }
 0x427   :  { %1865 = vmatprep.subr.mxu0 %v4352_v48  ;;  %1936 = vmatprep.subr.mxu1 %v4353_v61 }
 0x4c6   :  { %v1461_v3 = vpop.f32.mrf.mxu0  ;;  %v1532_v2 = vpop.f32.mrf.mxu1 }
 0x4c7   :  { %v1537_v26 = vadd.f32 %v1461_v3, %v4354_v58  ;;  %v1539_v20 = vadd.f32 %v1532_v2, %v4356_v50 }
 0x4c8   :  { %v1463_v47 = vpop.f32.mrf.mxu0  ;;  %v1534_v44 = vpop.f32.mrf.mxu1 }
 0x4c9   :  { %v1541_v45 = vmul.f32 0.5, %v1537_v26  ;;  %v1538_v46 = vadd.f32 %v1463_v47, %v4355_v49  ;;  %v1540_v43 = vadd.f32 %v1534_v44, %v4357_v62  ;;  %v2097_v62 = vld [vmem:[%s4128_s4 + $0x1e8] sm:$0xff]  ;;  %v2099_v44 = vld [vmem:[%s4128_s4 + $0x1f8] sm:$0xff] }
 0x4cb   :  { %2333 = vtanh.f32 %v1541_v45  ;;  %v1545_v52 = vmul.f32 0.5, %v1538_v46  ;;  %v1550_v48 = vmul.f32 0.5, %v1540_v43 }
 0x4cd   :  { %2335 = vtanh.f32 %v1545_v52 }
 0x4ce   :  { %2337 = vtanh.f32 %v1539_v20 }
 0x4cf   :  { %2339 = vtanh.f32 %v1550_v48  ;;  %v2096_v48 = vld [vmem:[%s4128_s4 + $0x1e0] sm:$0xff] }
 0x4d8   :  { %v2334_v59 = vpop.eup %2333 }
 0x4d9   :  { %v1543_v61 = vadd.f32 1.0, %v2334_v59 }
 0x4da   :  { %v2336_v56 = vpop.eup %2335 }
 0x4db   :  { %v1544_v63 = vmul.f32 0.5, %v1543_v61  ;;  %v1547_v3 = vadd.f32 1.0, %v2336_v56  ;;  %v2338_v58 = vpop.eup %2337  ;;  %v2098_v61 = vld [vmem:[%s4128_s4 + $0x1f0] sm:$0xff] }
 0x4dc   :  { %v2340_v52 = vpop.eup %2339 }
 0x4dd   :  { %v1548_v26 = vmul.f32 0.5, %v1547_v3  ;;  %v1555_v51 = vmul.f32 %v2338_v58, %v1544_v63  ;;  %v1552_v20 = vadd.f32 1.0, %v2340_v52  ;;  %v2093_v3 = vld [vmem:[%s4128_s4 + $0x1c8] sm:$0xff]  ;;  %v2095_v58 = vld [vmem:[%s4128_s4 + $0x1d8] sm:$0xff] }
 0x4de   :  { %v2091_v52 = vld [vmem:[%s4128_s4 + $0x1b8] sm:$0xff] }
 0x4df   :  { %v1554_v49 = vmul.f32 %v1548_v26, %v3753_v0  ;;  %v1553_v2 = vmul.f32 0.5, %v1552_v20  ;;  %v2092_v26 = vld [vmem:[%s4128_s4 + $0x1c0] sm:$0xff] }
 0x4e0   :  { %v2088_v20 = vld [vmem:[%s4128_s4 + $0x1a0] sm:$0xff] }
 0x4e1   :  { %v3830_v47 = vadd.f32 %v1555_v51, %v1554_v49  ;;  %v2094_v49 = vld [vmem:[%s4128_s4 + $0x1d0] sm:$0xff] }
 0x4e3   :  { %2341 = vtanh.f32 %v3830_v47 }
 0x4f0   :  { %v2342_v45 = vpop.eup %2341 }
 0x4f1   :  { %v1558_v43 = vmul.f32 %v2342_v45, %v1553_v2  ;;  %v2090_v2 = vld [vmem:[%s4128_s4 + $0x1b0] sm:$0xff]  ;;  %v2085_v45 = vld [vmem:[%s4128_s4 + $0x188] sm:$0xff] }
 0x4f3   :  { %2288 = vst [vmem:[%s4132_s6 + $0x20] sm:$0xff] %v1558_v43  ;;  %1695 = vmatmul.mubr.f32.vlgmr.msra.gmra.mxu0 %v1558_v43  ;;  %1766 = vmatmul.mubr.f32.vlgmr.msra.gmra.mxu1 %v1558_v43  ;;  %v2087_v43 = vld [vmem:[%s4128_s4 + $0x198] sm:$0xff] }
 0x4f4   :  { %1866 = vmatpush1.msra.mxu0 %v3300_v38  ;;  %1937 = vmatpush1.msra.mxu1 %v3305_v4  ;;  %v4358_v38 = vld [vmem:[#allocation7_spill] sm:$0xff]  ;;  %v4359_v4 = vld [vmem:[#allocation8_spill] sm:$0xff] }
 0x4f5   :  { %1867 = vmatprep.subr.mxu0 %v3312_v54  ;;  %1938 = vmatprep.subr.mxu1 %v3317_v11  ;;  %v4360_v54 = vld [vmem:[#allocation9_spill] sm:$0xff]  ;;  %v4361_v11 = vld [vmem:[#allocation10_spill] sm:$0xff] }
 0x4f6   :  { %1868 = vmatpush1.msra.mxu0 %v3324_v57  ;;  %1939 = vmatpush1.msra.mxu1 %v3329_v53  ;;  %v4362_v57 = vld [vmem:[#allocation11_spill] sm:$0xff]  ;;  %v4363_v53 = vld [vmem:[#allocation12_spill] sm:$0xff] }
 0x4f7   :  { %1869 = vmatprep.subr.mxu0 %v3336_v60  ;;  %1940 = vmatprep.subr.mxu1 %v3341_v1  ;;  %v4364_v60 = vld [vmem:[#allocation13_spill] sm:$0xff]  ;;  %v4365_v1 = vld [vmem:[#allocation14_spill] sm:$0xff] }
 0x4f8   :  { %1870 = vmatpush1.msra.mxu0 %v3348_v55  ;;  %1941 = vmatpush1.msra.mxu1 %v3353_v29  ;;  %v4366_v55 = vld [vmem:[#allocation15_spill] sm:$0xff]  ;;  %v4367_v29 = vld [vmem:[#allocation16_spill] sm:$0xff] }
 0x4f9   :  { %1871 = vmatprep.subr.mxu0 %v3360_v5  ;;  %1942 = vmatprep.subr.mxu1 %v3365_v6  ;;  %v4368_v5 = vld [vmem:[#allocation17_spill] sm:$0xff]  ;;  %v4369_v6 = vld [vmem:[#allocation18_spill] sm:$0xff] }
 0x4fa   :  { %1872 = vmatpush1.msra.mxu0 %v3372_v7  ;;  %1943 = vmatpush1.msra.mxu1 %v3377_v8  ;;  %v4370_v7 = vld [vmem:[#allocation19_spill] sm:$0xff]  ;;  %v4371_v8 = vld [vmem:[#allocation20_spill] sm:$0xff] }
 0x4fb   :  { %1873 = vmatprep.subr.mxu0 %v3384_v9  ;;  %1944 = vmatprep.subr.mxu1 %v3389_v10  ;;  %v4372_v9 = vld [vmem:[#allocation21_spill] sm:$0xff]  ;;  %v4373_v10 = vld [vmem:[#allocation22_spill] sm:$0xff] }
 0x4fc   :  { %1874 = vmatpush1.msra.mxu0 %v3396_v12  ;;  %1945 = vmatpush1.msra.mxu1 %v3401_v13  ;;  %v4374_v12 = vld [vmem:[#allocation23_spill] sm:$0xff]  ;;  %v4375_v13 = vld [vmem:[#allocation24_spill] sm:$0xff] }
 0x4fd   :  { %1875 = vmatprep.subr.mxu0 %v3408_v14  ;;  %1946 = vmatprep.subr.mxu1 %v3413_v15  ;;  %v4376_v14 = vmov 0.0   ;;  %v4377_v15 = vld [vmem:[#allocation25_spill] sm:$0xff] }
 0x4fe   :  { %1876 = vmatpush1.msra.mxu0 %v3420_v16  ;;  %1947 = vmatpush1.msra.mxu1 %v3425_v17  ;;  %v4378_v17 = vld [vmem:[#allocation41_spill] sm:$0xff] }
 0x4ff   :  { %1877 = vmatprep.subr.mxu0 %v3432_v18  ;;  %1948 = vmatprep.subr.mxu1 %v3437_v19 }
 0x500   :  { %1878 = vmatpush1.msra.mxu0 %v3444_v21  ;;  %1949 = vmatpush1.msra.mxu1 %v3449_v22 }
 0x501   :  { %1879 = vmatprep.subr.mxu0 %v3456_v23  ;;  %1950 = vmatprep.subr.mxu1 %v3461_v24  ;;  %v4379_v23 = vld [vmem:[#allocation43_spill] sm:$0xff] }
 0x502   :  { %1880 = vmatpush1.msra.mxu0 %v3468_v25  ;;  %1951 = vmatpush1.msra.mxu1 %v3473_v27  ;;  %v4380_v25 = vld [vmem:[#allocation42_spill] sm:$0xff] }
 0x503   :  { %1881 = vmatprep.subr.mxu0 %v3480_v28  ;;  %1952 = vmatprep.subr.mxu1 %v3485_v30 }
 0x504   :  { %1882 = vmatpush1.msra.mxu0 %v3490_v31  ;;  %1953 = vmatpush1.msra.mxu1 %v3497_v32  ;;  %v4381_v31 = vld [vmem:[#allocation44_spill] sm:$0xff] }
 0x505   :  { %1883 = vmatprep.subr.mxu0 %v3502_v33  ;;  %1954 = vmatprep.subr.mxu1 %v3507_v34 }
 0x506   :  { %1884 = vmatpush1.msra.mxu0 %v3514_v35  ;;  %1955 = vmatpush1.msra.mxu1 %v3519_v36 }
 0x507   :  { %1885 = vmatprep.subr.mxu0 %v3524_v37  ;;  %1956 = vmatprep.subr.mxu1 %v3531_v39 }
 0x508   :  { %1886 = vmatpush1.msra.mxu0 %v3536_v40  ;;  %1957 = vmatpush1.msra.mxu1 %v3541_v41 }
 0x509   :  { %1887 = vmatprep.subr.mxu0 %v3548_v42  ;;  %1958 = vmatprep.subr.mxu1 %v4358_v38  ;;  %v2084_v38 = vld [vmem:[%s4128_s4 + $0x180] sm:$0xff] }
 0x50a   :  { %1888 = vmatpush1.msra.mxu0 %v4359_v4  ;;  %1959 = vmatpush1.msra.mxu1 %v4360_v54  ;;  %v2086_v4 = vld [vmem:[%s4128_s4 + $0x190] sm:$0xff]  ;;  %v2081_v54 = vld [vmem:[%s4128_s4 + $0x168] sm:$0xff] }
 0x50b   :  { %1889 = vmatprep.subr.mxu0 %v4361_v11  ;;  %1960 = vmatprep.subr.mxu1 %v4362_v57  ;;  %v2083_v11 = vld [vmem:[%s4128_s4 + $0x178] sm:$0xff]  ;;  %v2080_v57 = vld [vmem:[%s4128_s4 + $0x160] sm:$0xff] }
 0x50c   :  { %1890 = vmatpush1.msra.mxu0 %v4363_v53  ;;  %1961 = vmatpush1.msra.mxu1 %v4364_v60  ;;  %v2082_v53 = vld [vmem:[%s4128_s4 + $0x170] sm:$0xff]  ;;  %v2077_v60 = vld [vmem:[%s4128_s4 + $0x148] sm:$0xff] }
 0x50d   :  { %1891 = vmatprep.subr.mxu0 %v4365_v1  ;;  %1962 = vmatprep.subr.mxu1 %v4366_v55  ;;  %v2079_v1 = vld [vmem:[%s4128_s4 + $0x158] sm:$0xff]  ;;  %v2076_v55 = vld [vmem:[%s4128_s4 + $0x140] sm:$0xff] }
 0x50e   :  { %1892 = vmatpush1.msra.mxu0 %v4367_v29  ;;  %1963 = vmatpush1.msra.mxu1 %v4368_v5  ;;  %v2078_v29 = vld [vmem:[%s4128_s4 + $0x150] sm:$0xff]  ;;  %v2073_v5 = vld [vmem:[%s4128_s4 + $0x128] sm:$0xff] }
 0x50f   :  { %1893 = vmatprep.subr.mxu0 %v4369_v6  ;;  %1964 = vmatprep.subr.mxu1 %v4370_v7  ;;  %v2075_v6 = vld [vmem:[%s4128_s4 + $0x138] sm:$0xff]  ;;  %v2072_v7 = vld [vmem:[%s4128_s4 + $0x120] sm:$0xff] }
 0x510   :  { %1894 = vmatpush1.msra.mxu0 %v4371_v8  ;;  %1965 = vmatpush1.msra.mxu1 %v4372_v9  ;;  %v2074_v8 = vld [vmem:[%s4128_s4 + $0x130] sm:$0xff]  ;;  %v2069_v9 = vld [vmem:[%s4128_s4 + $0x108] sm:$0xff] }
 0x511   :  { %1895 = vmatprep.subr.mxu0 %v4373_v10  ;;  %1966 = vmatprep.subr.mxu1 %v4374_v12  ;;  %v2071_v10 = vld [vmem:[%s4128_s4 + $0x118] sm:$0xff]  ;;  %v2068_v12 = vld [vmem:[%s4128_s4 + $0x100] sm:$0xff] }
 0x512   :  { %1896 = vmatpush1.msra.mxu0 %v4375_v13  ;;  %1929 = vmatprep.mubr.f32.mxu0 %v4376_v14  ;;  %v2070_v13 = vld [vmem:[%s4128_s4 + $0x110] sm:$0xff] }
 0x513   :  { %1967 = vmatpush1.msra.mxu1 %v4377_v15  ;;  %2000 = vmatprep.mubr.f32.mxu1 %v4376_v14  ;;  %v2067_v15 = vld [vmem:[%s4128_s4 + $0xf8] sm:$0xff] }
 0x514   :  { %2100 = vmatprep.subr.mxu0 %v2097_v62  ;;  %2171 = vmatprep.subr.mxu1 %v2099_v44  ;;  %v2038_v62 = vld [vmem:[%s4128_s4 + $0x10] sm:$0xff] }
 0x5b3   :  { %v1696_v16 = vpop.f32.mrf.mxu0  ;;  %v1767_v19 = vpop.f32.mrf.mxu1 }
 0x5b4   :  { %v1772_v18 = vadd.f32 %v1696_v16, %v4378_v17  ;;  %v1774_v27 = vadd.f32 %v1767_v19, %v4380_v25  ;;  %v2064_v16 = vld [vmem:[%s4128_s4 + $0xe0] sm:$0xff]  ;;  %v2066_v17 = vld [vmem:[%s4128_s4 + $0xf0] sm:$0xff]  ;;  %v2063_v19 = vld [vmem:[%s4128_s4 + $0xd8] sm:$0xff] }
 0x5b5   :  { %v1698_v21 = vpop.f32.mrf.mxu0  ;;  %v1769_v30 = vpop.f32.mrf.mxu1  ;;  %v2056_v25 = vld [vmem:[%s4128_s4 + $0xa0] sm:$0xff] }
 0x5b6   :  { %v1776_v22 = vmul.f32 0.5, %v1772_v18  ;;  %v1773_v24 = vadd.f32 %v1698_v21, %v4379_v23  ;;  %v1775_v32 = vadd.f32 %v1769_v30, %v4381_v31  ;;  %v2061_v18 = vld [vmem:[%s4128_s4 + $0xc8] sm:$0xff]  ;;  %v2060_v21 = vld [vmem:[%s4128_s4 + $0xc0] sm:$0xff]  ;;  %v2055_v30 = vld [vmem:[%s4128_s4 + $0x98] sm:$0xff] }
 0x5b7   :  { %v2057_v23 = vld [vmem:[%s4128_s4 + $0xa8] sm:$0xff]  ;;  %v2052_v31 = vld [vmem:[%s4128_s4 + $0x80] sm:$0xff] }
 0x5b8   :  { %2343 = vtanh.f32 %v1776_v22  ;;  %v1780_v28 = vmul.f32 0.5, %v1773_v24  ;;  %v1785_v33 = vmul.f32 0.5, %v1775_v32  ;;  %v2062_v22 = vld [vmem:[%s4128_s4 + $0xd0] sm:$0xff]  ;;  %v2059_v24 = vld [vmem:[%s4128_s4 + $0xb8] sm:$0xff] }
 0x5b9   :  { %v2054_v32 = vld [vmem:[%s4128_s4 + $0x90] sm:$0xff] }
 0x5ba   :  { %2345 = vtanh.f32 %v1780_v28  ;;  %v2053_v28 = vld [vmem:[%s4128_s4 + $0x88] sm:$0xff] }
 0x5bb   :  { %2347 = vtanh.f32 %v1774_v27  ;;  %v2058_v27 = vld [vmem:[%s4128_s4 + $0xb0] sm:$0xff] }
 0x5bc   :  { %2349 = vtanh.f32 %v1785_v33  ;;  %v2049_v33 = vld [vmem:[%s4128_s4 + $0x68] sm:$0xff] }
 0x5c5   :  { %v2344_v34 = vpop.eup %2343 }
 0x5c6   :  { %v1778_v35 = vadd.f32 1.0, %v2344_v34  ;;  %v2051_v34 = vld [vmem:[%s4128_s4 + $0x78] sm:$0xff] }
 0x5c7   :  { %v2346_v36 = vpop.eup %2345 }
 0x5c8   :  { %v1779_v37 = vmul.f32 0.5, %v1778_v35  ;;  %v1782_v39 = vadd.f32 1.0, %v2346_v36  ;;  %v2348_v40 = vpop.eup %2347  ;;  %v2048_v35 = vld [vmem:[%s4128_s4 + $0x60] sm:$0xff]  ;;  %v2050_v36 = vld [vmem:[%s4128_s4 + $0x70] sm:$0xff] }
 0x5c9   :  { %v2350_v63 = vpop.eup %2349 }
 0x5ca   :  { %v1783_v41 = vmul.f32 0.5, %v1782_v39  ;;  %v1790_v42 = vmul.f32 %v2348_v40, %v1779_v37  ;;  %v1787_v56 = vadd.f32 1.0, %v2350_v63  ;;  %v2045_v37 = vld [vmem:[%s4128_s4 + $0x48] sm:$0xff]  ;;  %v2047_v39 = vld [vmem:[%s4128_s4 + $0x58] sm:$0xff]  ;;  %v2044_v40 = vld [vmem:[%s4128_s4 + $0x40] sm:$0xff] }
 0x5cb   :  { %v2040_v63 = vld [vmem:[%s4128_s4 + $0x20] sm:$0xff] }
 0x5cc   :  { %v1789_v0 = vmul.f32 %v1783_v41, %v3830_v47  ;;  %v1788_v59 = vmul.f32 0.5, %v1787_v56  ;;  %v2089_v47 = vld [vmem:[%s4128_s4 + $0x1a8] sm:$0xff]  ;;  %v2046_v41 = vld [vmem:[%s4128_s4 + $0x50] sm:$0xff] }
 0x5cd   :  { %v2042_v56 = vld [vmem:[%s4128_s4 + $0x30] sm:$0xff] }
 0x5ce   :  { %v3905_v51 = vadd.f32 %v1790_v42, %v1789_v0  ;;  %v2041_v42 = vld [vmem:[%s4128_s4 + $0x28] sm:$0xff]  ;;  %v2043_v0 = vld [vmem:[%s4128_s4 + $0x38] sm:$0xff] }
 0x5d0   :  { %2351 = vtanh.f32 %v3905_v51 }
 0x5dd   :  { %v2352_v46 = vpop.eup %2351 }
 0x5de   :  { %v1793_v50 = vmul.f32 %v2352_v46, %v1788_v59  ;;  %v2037_v59 = vld [vmem:[%s4128_s4 + $0x8] sm:$0xff]  ;;  %v2039_v46 = vld [vmem:[%s4128_s4 + $0x18] sm:$0xff] }
 0x5e0   :  { %2289 = vst [vmem:[%s4132_s6 + $0x28] sm:$0xff] %v1793_v50  ;;  %1930 = vmatmul.mubr.f32.vlgmr.msra.gmra.mxu0 %v1793_v50  ;;  %2001 = vmatmul.mubr.f32.vlgmr.msra.gmra.mxu1 %v1793_v50  ;;  %v2036_v50 = vld [vmem:[%s4128_s4] sm:$0xff] }
 0x5e1   :  { %2164 = vmatprep.mubr.f32.mxu0 %v4376_v14  ;;  %2235 = vmatprep.mubr.f32.mxu1 %v4376_v14  ;;  %v2065_v14 = vld [vmem:[%s4128_s4 + $0xe8] sm:$0xff] }
 0x5e2   :  { %2101 = vmatpush1.msra.mxu0 %v2096_v48  ;;  %2172 = vmatpush1.msra.mxu1 %v2098_v61  ;;  %v4382_v48 = vld [vmem:[#allocation45_spill] sm:$0xff] }
 0x5e3   :  { %2102 = vmatprep.subr.mxu0 %v2093_v3  ;;  %2173 = vmatprep.subr.mxu1 %v2095_v58 }
 0x5e4   :  { %2103 = vmatpush1.msra.mxu0 %v2092_v26  ;;  %2174 = vmatpush1.msra.mxu1 %v2094_v49  ;;  %v4383_v49 = vld [vmem:[#allocation47_spill] sm:$0xff] }
 0x5e5   :  { %2104 = vmatprep.subr.mxu0 %v2089_v47  ;;  %2175 = vmatprep.subr.mxu1 %v2091_v52  ;;  %v4384_v52 = vld [vmem:[#allocation46_spill] sm:$0xff] }
 0x5e6   :  { %2105 = vmatpush1.msra.mxu0 %v2088_v20  ;;  %2176 = vmatpush1.msra.mxu1 %v2090_v2 }
 0x5e7   :  { %2106 = vmatprep.subr.mxu0 %v2085_v45  ;;  %2177 = vmatprep.subr.mxu1 %v2087_v43  ;;  %v4385_v43 = vld [vmem:[#allocation48_spill] sm:$0xff] }
 0x5e8   :  { %2107 = vmatpush1.msra.mxu0 %v2084_v38  ;;  %2178 = vmatpush1.msra.mxu1 %v2086_v4 }
 0x5e9   :  { %2108 = vmatprep.subr.mxu0 %v2081_v54  ;;  %2179 = vmatprep.subr.mxu1 %v2083_v11 }
 0x5ea   :  { %2109 = vmatpush1.msra.mxu0 %v2080_v57  ;;  %2180 = vmatpush1.msra.mxu1 %v2082_v53 }
 0x5eb   :  { %2110 = vmatprep.subr.mxu0 %v2077_v60  ;;  %2181 = vmatprep.subr.mxu1 %v2079_v1 }
 0x5ec   :  { %2111 = vmatpush1.msra.mxu0 %v2076_v55  ;;  %2182 = vmatpush1.msra.mxu1 %v2078_v29 }
 0x5ed   :  { %2112 = vmatprep.subr.mxu0 %v2073_v5  ;;  %2183 = vmatprep.subr.mxu1 %v2075_v6 }
 0x5ee   :  { %2113 = vmatpush1.msra.mxu0 %v2072_v7  ;;  %2184 = vmatpush1.msra.mxu1 %v2074_v8 }
 0x5ef   :  { %2114 = vmatprep.subr.mxu0 %v2069_v9  ;;  %2185 = vmatprep.subr.mxu1 %v2071_v10 }
 0x5f0   :  { %2115 = vmatpush1.msra.mxu0 %v2068_v12  ;;  %2186 = vmatpush1.msra.mxu1 %v2070_v13 }
 0x5f1   :  { %2116 = vmatprep.subr.mxu0 %v2065_v14  ;;  %2187 = vmatprep.subr.mxu1 %v2067_v15  ;;  %v4386_v14 = vld [vmem:[#allocation49_spill] sm:$0xff] }
 0x5f2   :  { %2117 = vmatpush1.msra.mxu0 %v2064_v16  ;;  %2188 = vmatpush1.msra.mxu1 %v2066_v17 }
 0x5f3   :  { %2118 = vmatprep.subr.mxu0 %v2061_v18  ;;  %2189 = vmatprep.subr.mxu1 %v2063_v19 }
 0x5f4   :  { %2119 = vmatpush1.msra.mxu0 %v2060_v21  ;;  %2190 = vmatpush1.msra.mxu1 %v2062_v22  ;;  %v4388_v21 = vld [vmem:[#allocation50_spill] sm:$0xff] }
 0x5f5   :  { %2120 = vmatprep.subr.mxu0 %v2057_v23  ;;  %2191 = vmatprep.subr.mxu1 %v2059_v24 }
 0x5f6   :  { %2121 = vmatpush1.msra.mxu0 %v2056_v25  ;;  %2192 = vmatpush1.msra.mxu1 %v2058_v27  ;;  %v4389_v25 = vld [vmem:[#allocation52_spill] sm:$0xff] }
 0x5f7   :  { %2122 = vmatprep.subr.mxu0 %v2053_v28  ;;  %2193 = vmatprep.subr.mxu1 %v2055_v30 }
 0x5f8   :  { %2123 = vmatpush1.msra.mxu0 %v2052_v31  ;;  %2194 = vmatpush1.msra.mxu1 %v2054_v32 }
 0x5f9   :  { %2124 = vmatprep.subr.mxu0 %v2049_v33  ;;  %2195 = vmatprep.subr.mxu1 %v2051_v34 }
 0x5fa   :  { %2125 = vmatpush1.msra.mxu0 %v2048_v35  ;;  %2196 = vmatpush1.msra.mxu1 %v2050_v36 }
 0x5fb   :  { %2126 = vmatprep.subr.mxu0 %v2045_v37  ;;  %2197 = vmatprep.subr.mxu1 %v2047_v39 }
 0x5fc   :  { %2127 = vmatpush1.msra.mxu0 %v2044_v40  ;;  %2198 = vmatpush1.msra.mxu1 %v2046_v41 }
 0x5fd   :  { %2128 = vmatprep.subr.mxu0 %v2041_v42  ;;  %2199 = vmatprep.subr.mxu1 %v2043_v0 }
 0x5fe   :  { %2129 = vmatpush1.msra.mxu0 %v2040_v63  ;;  %2200 = vmatpush1.msra.mxu1 %v2042_v56 }
 0x5ff   :  { %2130 = vmatprep.subr.mxu0 %v2037_v59  ;;  %2201 = vmatprep.subr.mxu1 %v2039_v46 }
 0x600   :  { %2131 = vmatpush1.msra.mxu0 %v2036_v50  ;;  %2202 = vmatpush1.msra.mxu1 %v2038_v62 }
 0x6a0   :  { %v1931_v44 = vpop.f32.mrf.mxu0  ;;  %v2002_v3 = vpop.f32.mrf.mxu1 }
 0x6a1   :  { %v2007_v61 = vadd.f32 %v1931_v44, %v4382_v48  ;;  %v2009_v20 = vadd.f32 %v2002_v3, %v4384_v52 }
 0x6a2   :  { %v1933_v58 = vpop.f32.mrf.mxu0  ;;  %v2004_v45 = vpop.f32.mrf.mxu1 }
 0x6a3   :  { %v2011_v26 = vmul.f32 0.5, %v2007_v61  ;;  %v2008_v47 = vadd.f32 %v1933_v58, %v4383_v49  ;;  %v2010_v38 = vadd.f32 %v2004_v45, %v4385_v43 }
 0x6a5   :  { %2353 = vtanh.f32 %v2011_v26  ;;  %v2015_v2 = vmul.f32 0.5, %v2008_v47  ;;  %v2020_v4 = vmul.f32 0.5, %v2010_v38 }
 0x6a7   :  { %2355 = vtanh.f32 %v2015_v2 }
 0x6a8   :  { %2357 = vtanh.f32 %v2009_v20 }
 0x6a9   :  { %2359 = vtanh.f32 %v2020_v4 }
 0x6b2   :  { %v2354_v54 = vpop.eup %2353 }
 0x6b3   :  { %v2013_v11 = vadd.f32 1.0, %v2354_v54 }
 0x6b4   :  { %v2356_v57 = vpop.eup %2355 }
 0x6b5   :  { %v2014_v53 = vmul.f32 0.5, %v2013_v11  ;;  %v2017_v60 = vadd.f32 1.0, %v2356_v57  ;;  %v2358_v1 = vpop.eup %2357 }
 0x6b6   :  { %v2360_v7 = vpop.eup %2359 }
 0x6b7   :  { %v2018_v55 = vmul.f32 0.5, %v2017_v60  ;;  %v2025_v29 = vmul.f32 %v2358_v1, %v2014_v53  ;;  %v2022_v8 = vadd.f32 1.0, %v2360_v7 }
 0x6b9   :  { %v2024_v5 = vmul.f32 %v2018_v55, %v3905_v51  ;;  %v2023_v9 = vmul.f32 0.5, %v2022_v8  ;;  %v4387_v51 = vld [vmem:[#allocation51_spill] sm:$0xff] }
 0x6bb   :  { %v2026_v6 = vadd.f32 %v2025_v29, %v2024_v5 }
 0x6bd   :  { %2361 = vtanh.f32 %v2026_v6 }
 0x6ca   :  { %v2362_v10 = vpop.eup %2361 }
 0x6cb   :  { %v2028_v12 = vmul.f32 %v2362_v10, %v2023_v9 }
 0x6cd   :  { %2290 = vst [vmem:[%s4132_s6 + $0x30] sm:$0xff] %v2028_v12  ;;  %2165 = vmatmul.mubr.f32.vlgmr.msra.gmra.mxu0 %v2028_v12  ;;  %2236 = vmatmul.mubr.f32.vlgmr.msra.gmra.mxu1 %v2028_v12 }
 0x78d   :  { %v2166_v13 = vpop.f32.mrf.mxu0  ;;  %v2237_v16 = vpop.f32.mrf.mxu1 }
 0x78e   :  { %v2242_v15 = vadd.f32 %v2166_v13, %v4386_v14  ;;  %v2244_v22 = vadd.f32 %v2237_v16, %v4388_v21 }
 0x78f   :  { %v2168_v17 = vpop.f32.mrf.mxu0  ;;  %v2239_v24 = vpop.f32.mrf.mxu1 }
 0x790   :  { %v2246_v18 = vmul.f32 0.5, %v2242_v15  ;;  %v2243_v19 = vadd.f32 %v2168_v17, %v4387_v51  ;;  %v2245_v27 = vadd.f32 %v2239_v24, %v4389_v25 }
 0x792   :  { %2363 = vtanh.f32 %v2246_v18  ;;  %v2250_v23 = vmul.f32 0.5, %v2243_v19  ;;  %v2255_v28 = vmul.f32 0.5, %v2245_v27 }
 0x794   :  { %2365 = vtanh.f32 %v2250_v23 }
 0x795   :  { %2367 = vtanh.f32 %v2244_v22 }
 0x796   :  { %2369 = vtanh.f32 %v2255_v28 }
 0x79f   :  { %v2364_v30 = vpop.eup %2363 }
 0x7a0   :  { %v2248_v31 = vadd.f32 1.0, %v2364_v30 }
 0x7a1   :  { %v2366_v32 = vpop.eup %2365 }
 0x7a2   :  { %v2249_v33 = vmul.f32 0.5, %v2248_v31  ;;  %v2252_v34 = vadd.f32 1.0, %v2366_v32  ;;  %v2368_v35 = vpop.eup %2367 }
 0x7a3   :  { %v2370_v41 = vpop.eup %2369 }
 0x7a4   :  { %v2253_v36 = vmul.f32 0.5, %v2252_v34  ;;  %v2260_v37 = vmul.f32 %v2368_v35, %v2249_v33  ;;  %v2257_v42 = vadd.f32 1.0, %v2370_v41 }
 0x7a6   :  { %v2259_v39 = vmul.f32 %v2253_v36, %v2026_v6  ;;  %v2258_v0 = vmul.f32 0.5, %v2257_v42 }
 0x7a8   :  { %v2261_v40 = vadd.f32 %v2260_v37, %v2259_v39 }
 0x7aa   :  { %2371 = vtanh.f32 %v2261_v40  ;;  %2272 = vst [vmem:[%s4133_s8] sm:$0xff] %v2261_v40 }
 0x7b7   :  { %v2372_v63 = vpop.eup %2371 }
 0x7b8   :  { %v2263_v56 = vmul.f32 %v2372_v63, %v2258_v0 }
 0x7ba   :  { %2291 = vst [vmem:[%s4132_s6 + $0x38] sm:$0xff] %v2263_v56  ;;  %2271 = vst [vmem:[%s4134_s7] sm:$0xff] %v2263_v56 }

</bundles_post_ra>
